<compile_context>
chip_gen: v6e
topology: v6e:2x2x1
jax: 0.10.0
libtpu: 0.0.40
codegen_flags: <defaults>
</compile_context>

<pallas_src>
import functools
import math

import jax
import jax.numpy as jnp
from jax import lax
from jax.experimental import pallas as pl
from jax.experimental.pallas import tpu as pltpu


# ------------------------- fused Encoder kernel ------------------------------

def _encoder_kernel(x_ref, w1_ref, b1_ref, w2_ref, b2_ref, o_ref, xp_ref,
                    *, if_pool, H, W, Cin, Cout):
    # x_ref  : pool -> (1, H, 2, W, 2*Cin) f32 ; no-pool -> (1, H, W, Cin) f32
    # w1_ref : (9*Cin,  Cout) bf16   (tap-major: row = (dy*3+dx)*Cin + cin)
    # w2_ref : (9*Cout, Cout) bf16
    # b*_ref : (1, Cout) f32
    # o_ref  : (1, H, W, Cout) f32
    # xp_ref : VMEM (H+2, Wp, Cm) bf16 halo scratch, Wp = roundup(W+2, 8),
    #          Cm = max(Cin, Cout).  Reused for both convs.
    zdt = xp_ref.dtype
    Hp, Wp, Cm = xp_ref.shape

    # ---- zero only the 1-wide halo border (4 tiny strips), every step --------
    xp_ref[0:1, :, :] = jnp.zeros((1, Wp, Cm), zdt)
    xp_ref[H + 1:H + 2, :, :] = jnp.zeros((1, Wp, Cm), zdt)
    xp_ref[:, 0:1, :] = jnp.zeros((Hp, 1, Cm), zdt)
    xp_ref[:, W + 1:W + 2, :] = jnp.zeros((Hp, 1, Cm), zdt)

    # ---- MaxPool2d(2): H-pairs are a leading dim, W-pairs are lane halves ----
    if if_pool:
        xr = x_ref[0]                                        # (H, 2, W, 2*Cin)
        hmax = jnp.maximum(xr[:, 0], xr[:, 1])               # (H, W, 2*Cin)
        x0 = jnp.maximum(hmax[:, :, :Cin], hmax[:, :, Cin:])  # (H, W, Cin) f32
    else:
        x0 = x_ref[0]                                        # (H, W, Cin) f32

    xp_ref[1:H + 1, 1:W + 1, 0:Cin] = x0.astype(zdt)

    def conv3x3_relu(cin, w_ref, b_ref):
        # 3x3 conv, padding=1, as 9 tap-accumulated bf16 MXU matmuls (f32 acc).
        acc = jnp.zeros((H * W, Cout), jnp.float32)
        for t in range(9):                                   # static unroll
            dy, dx = t // 3, t % 3
            patch = xp_ref[dy:dy + H, dx:dx + W, 0:cin].reshape(H * W, cin)
            acc = acc + jnp.dot(patch, w_ref[t * cin:(t + 1) * cin, :],
                                preferred_element_type=jnp.float32)
        return jnp.maximum(acc + b_ref[...], 0.0)            # bias + ReLU in f32

    a1 = conv3x3_relu(Cin, w1_ref, b1_ref)                   # (H*W, Cout) f32
    # intermediate activation stays in VMEM (bf16), border stays zero
    xp_ref[1:H + 1, 1:W + 1, 0:Cout] = a1.reshape(H, W, Cout).astype(zdt)
    a2 = conv3x3_relu(Cout, w2_ref, b2_ref)
    o_ref[0] = a2.reshape(H, W, Cout).astype(o_ref.dtype)


# ------------------------------- wrapper --------------------------------------

def _round_up(x, m):
    return ((x + m - 1) // m) * m


@functools.partial(jax.jit, static_argnames=("if_pool",))
def encoder_forward(x_nchw, packed, if_pool=True):
    """Matches Encoder.forward. Input/output are NCHW (PyTorch layout)."""
    w1, b1, w2, b2 = packed["w1"], packed["b1"], packed["w2"], packed["b2"]
    Cin, Cout = w1.shape[0] // 9, w1.shape[1]

    # NCHW -> NHWC at the module boundary (in a full net, hoist this to the
    # model boundary and stay NHWC end-to-end so the transposes disappear).
    x = jnp.transpose(x_nchw, (0, 2, 3, 1)).astype(jnp.float32)
    N, H_in, W_in, _ = x.shape

    if if_pool:
        Ho, Wo = H_in // 2, W_in // 2                 # PyTorch MaxPool2d(2) floors
        x = x[:, :2 * Ho, :2 * Wo, :]
        # Fold W-pooling pairs into the lane axis and H-pooling pairs into a
        # leading dim.  Contiguous reshape: no strided loads inside the kernel.
        x = x.reshape(N, Ho, 2, Wo, 2 * Cin)
        x_block = (1, Ho, 2, Wo, 2 * Cin)
        x_index = lambda n: (n, 0, 0, 0, 0)
    else:
        Ho, Wo = H_in, W_in
        x_block = (1, Ho, Wo, Cin)
        x_index = lambda n: (n, 0, 0, 0)

    Cm = max(Cin, Cout)
    Wp = _round_up(Wo + 2, 8)                          # sublane-aligned halo width

    kernel = functools.partial(_encoder_kernel, if_pool=if_pool,
                               H=Ho, W=Wo, Cin=Cin, Cout=Cout)

    # Real (unpadded) cost numbers.
    flops = 2 * N * Ho * Wo * 9 * (Cin * Cout + Cout * Cout)
    bytes_accessed = (x.size * x.dtype.itemsize
                      + (w1.size + w2.size) * 2 + (b1.size + b2.size) * 4
                      + N * Ho * Wo * Cout * 4)

    # VMEM footprint: double-buffered in/out blocks + weights + halo scratch.
    vmem_need = (2 * math.prod(x_block) * 4
                 + 2 * Ho * Wo * Cout * 4
                 + 2 * ((w1.size + w2.size) * 2 + (b1.size + b2.size) * 4)
                 + (Ho + 2) * Wp * Cm * 2)
    vmem_limit = int(min(max(4 * vmem_need + (1 << 20), 4 << 20), 64 << 20))

    out = pl.pallas_call(
        kernel,
        out_shape=jax.ShapeDtypeStruct((N, Ho, Wo, Cout), jnp.float32),
        grid=(N,),
        in_specs=[
            pl.BlockSpec(x_block, x_index),
            pl.BlockSpec(w1.shape, lambda n: (0, 0)),
            pl.BlockSpec(b1.shape, lambda n: (0, 0)),
            pl.BlockSpec(w2.shape, lambda n: (0, 0)),
            pl.BlockSpec(b2.shape, lambda n: (0, 0)),
        ],
        out_specs=pl.BlockSpec((1, Ho, Wo, Cout), lambda n: (n, 0, 0, 0)),
        scratch_shapes=[pltpu.VMEM((Ho + 2, Wp, Cm), jnp.bfloat16)],
        compiler_params=pltpu.CompilerParams(
            dimension_semantics=("parallel",),
            vmem_limit_bytes=vmem_limit),
        cost_estimate=pl.CostEstimate(flops=flops, transcendentals=0,
                                      bytes_accessed=bytes_accessed),
    )(x, w1, b1, w2, b2)

    return jnp.transpose(out, (0, 3, 1, 2))            # NHWC -> NCHW


# ------------------------------ params / reference ----------------------------

def init_encoder_params(key, in_channels, out_channels):
    k1, k2, k3, k4 = jax.random.split(key, 4)
    # Weights stored HWIO (semantically equivalent to PyTorch OIHW; synthetic init).
    w1 = jax.random.normal(k1, (3, 3, in_channels, out_channels), jnp.float32) * 0.1
    b1 = jax.random.normal(k2, (out_channels,), jnp.float32) * 0.1
    w2 = jax.random.normal(k3, (3, 3, out_channels, out_channels), jnp.float32) * 0.1
    b2 = jax.random.normal(k4, (out_channels,), jnp.float32) * 0.1
    return {"w1": w1, "b1": b1, "w2": w2, "b2": b2}


def prepare_encoder_params(params):
    """One-time packing: HWIO (3,3,Ci,Co) -> tap-major (9*Ci, Co) bf16 for the MXU."""
    def pack(w):
        kh, kw, ci, co = w.shape
        return w.reshape(kh * kw * ci, co).astype(jnp.bfloat16)
    return {"w1": pack(params["w1"]),
            "b1": params["b1"].reshape(1, -1).astype(jnp.float32),
            "w2": pack(params["w2"]),
            "b2": params["b2"].reshape(1, -1).astype(jnp.float32)}


def encoder_reference(x_nchw, params, if_pool=True, matmul_dtype=jnp.float32):
    """Pure-JAX reference. matmul_dtype=bfloat16 mimics the kernel's precision
    (bf16 conv operands, f32 accumulation, f32 bias+ReLU)."""
    x = jnp.transpose(x_nchw, (0, 2, 3, 1)).astype(jnp.float32)
    if if_pool:
        N, H, W, C = x.shape
        x = x[:, :(H // 2) * 2, :(W // 2) * 2, :]
        x = x.reshape(N, H // 2, 2, W // 2, 2, C).max(axis=(2, 4))
    for w, b in ((params["w1"], params["b1"]), (params["w2"], params["b2"])):
        y = lax.conv_general_dilated(
            x.astype(matmul_dtype), w.astype(matmul_dtype),
            window_strides=(1, 1), padding="SAME",
            dimension_numbers=("NHWC", "HWIO", "NHWC"),
            preferred_element_type=jnp.float32)
        x = jnp.maximum(y + b.astype(jnp.float32), 0.0)
    return jnp.transpose(x, (0, 3, 1, 2))


if __name__ == "__main__":
    key = jax.random.PRNGKey(0)
    kx, kp = jax.random.split(key)

    in_channels, out_channels = 4, 8
    x = jax.random.normal(kx, (2, in_channels, 16, 16), jnp.float32)  # NCHW
    params = init_encoder_params(kp, in_channels, out_channels)
    packed = prepare_encoder_params(params)                           # once, at init

    # ---- if_pool=True path ----
    y = jax.block_until_ready(encoder_forward(x, packed, if_pool=True))
    assert y.shape == (2, out_channels, 8, 8), y.shape
    y_ref_mix = encoder_reference(x, params, True, jnp.bfloat16)   # same precision path
    assert jnp.allclose(y, y_ref_mix, atol=5e-3, rtol=5e-3), "mismatch vs bf16 reference"
    y_ref_f32 = encoder_reference(x, params, True, jnp.float32)    # module (f32) semantics
    assert jnp.allclose(y, y_ref_f32, atol=5e-2, rtol=5e-2), "mismatch vs f32 reference"

    # ---- if_pool=False path ----
    y2 = jax.block_until_ready(encoder_forward(x, packed, if_pool=False))
    assert y2.shape == (2, out_channels, 16, 16), y2.shape
    y2_ref = encoder_reference(x, params, False, jnp.bfloat16)
    assert jnp.allclose(y2, y2_ref, atol=5e-3, rtol=5e-3), "mismatch (no-pool) vs reference"

    print("KERNEL_OK")
</pallas_src>

<mosaic_0001>
module attributes {stable_mosaic.version = 11 : i64} {
  func.func @_encoder_kernel(%arg0: i32, %arg1: memref<1x8x2x8x8xf32, #tpu.memory_space<vmem>>, %arg2: memref<36x8xbf16, #tpu.memory_space<vmem>>, %arg3: memref<1x8xf32, #tpu.memory_space<vmem>>, %arg4: memref<72x8xbf16, #tpu.memory_space<vmem>>, %arg5: memref<1x8xf32, #tpu.memory_space<vmem>>, %arg6: memref<1x8x8x8xf32, #tpu.memory_space<vmem>>, %arg7: memref<10x16x8xbf16, #tpu.memory_space<vmem>>) attributes {dimension_semantics = [#tpu.dimension_semantics<parallel>], iteration_bounds = array<i64: 2>, scalar_prefetch = 0 : i64, scratch_operands = 1 : i64, tpu.core_type = #tpu.core_type<tc>, window_params = [{transform_indices = @transform_0, window_bounds = array<i64: 1, 8, 2, 8, 8>}, {pipeline_mode = #tpu.pipeline_mode<synchronous>, transform_indices = @transform_1, window_bounds = array<i64: 36, 8>}, {pipeline_mode = #tpu.pipeline_mode<synchronous>, transform_indices = @transform_2, window_bounds = array<i64: 1, 8>}, {pipeline_mode = #tpu.pipeline_mode<synchronous>, transform_indices = @transform_3, window_bounds = array<i64: 72, 8>}, {pipeline_mode = #tpu.pipeline_mode<synchronous>, transform_indices = @transform_4, window_bounds = array<i64: 1, 8>}, {transform_indices = @transform_5, window_bounds = array<i64: 1, 8, 8, 8>}]} {
    %cst = arith.constant 0.000000e+00 : bf16
    %0 = vector.broadcast %cst : bf16 to vector<1x16x8xbf16>
    %c0 = arith.constant 0 : index
    %c0_0 = arith.constant 0 : index
    %c0_1 = arith.constant 0 : index
    %1 = vector.load %arg7[%c0, %c0_0, %c0_1] : memref<10x16x8xbf16, #tpu.memory_space<vmem>>, vector<1x16x8xbf16>
    tpu.vector_store %arg7[%c0, %c0_0, %c0_1], %0 {strides = array<i32>} : memref<10x16x8xbf16, #tpu.memory_space<vmem>>, vector<1x16x8xbf16>,
    %cst_2 = arith.constant 0.000000e+00 : bf16
    %2 = vector.broadcast %cst_2 : bf16 to vector<1x16x8xbf16>
    %c9 = arith.constant 9 : index
    %c0_3 = arith.constant 0 : index
    %c0_4 = arith.constant 0 : index
    %3 = vector.load %arg7[%c9, %c0_3, %c0_4] : memref<10x16x8xbf16, #tpu.memory_space<vmem>>, vector<1x16x8xbf16>
    tpu.vector_store %arg7[%c9, %c0_3, %c0_4], %2 {strides = array<i32>} : memref<10x16x8xbf16, #tpu.memory_space<vmem>>, vector<1x16x8xbf16>,
    %cst_5 = arith.constant 0.000000e+00 : bf16
    %4 = vector.broadcast %cst_5 : bf16 to vector<10x1x8xbf16>
    %c0_6 = arith.constant 0 : index
    %c0_7 = arith.constant 0 : index
    %c0_8 = arith.constant 0 : index
    %5 = vector.load %arg7[%c0_6, %c0_7, %c0_8] : memref<10x16x8xbf16, #tpu.memory_space<vmem>>, vector<10x1x8xbf16>
    tpu.vector_store %arg7[%c0_6, %c0_7, %c0_8], %4 {strides = array<i32>} : memref<10x16x8xbf16, #tpu.memory_space<vmem>>, vector<10x1x8xbf16>,
    %cst_9 = arith.constant 0.000000e+00 : bf16
    %6 = vector.broadcast %cst_9 : bf16 to vector<10x1x8xbf16>
    %c0_10 = arith.constant 0 : index
    %c9_11 = arith.constant 9 : index
    %c0_12 = arith.constant 0 : index
    %7 = vector.load %arg7[%c0_10, %c9_11, %c0_12] : memref<10x16x8xbf16, #tpu.memory_space<vmem>>, vector<10x1x8xbf16>
    tpu.vector_store %arg7[%c0_10, %c9_11, %c0_12], %6 {strides = array<i32>} : memref<10x16x8xbf16, #tpu.memory_space<vmem>>, vector<10x1x8xbf16>,
    %c0_13 = arith.constant 0 : index
    %c0_14 = arith.constant 0 : index
    %c0_15 = arith.constant 0 : index
    %c0_16 = arith.constant 0 : index
    %c0_17 = arith.constant 0 : index
    %8 = vector.load %arg1[%c0_13, %c0_14, %c0_15, %c0_16, %c0_17] : memref<1x8x2x8x8xf32, #tpu.memory_space<vmem>>, vector<1x8x2x8x8xf32>
    %9 = vector.shape_cast %8 : vector<1x8x2x8x8xf32> to vector<8x2x8x8xf32>
    %10 = vector.extract_strided_slice %9 {offsets = [0, 0, 0, 0], sizes = [8, 1, 8, 8], strides = [1, 1, 1, 1]} : vector<8x2x8x8xf32> to vector<8x1x8x8xf32>
    %11 = vector.shape_cast %10 : vector<8x1x8x8xf32> to vector<8x8x8xf32>
    %12 = vector.extract_strided_slice %9 {offsets = [0, 1, 0, 0], sizes = [8, 1, 8, 8], strides = [1, 1, 1, 1]} : vector<8x2x8x8xf32> to vector<8x1x8x8xf32>
    %13 = vector.shape_cast %12 : vector<8x1x8x8xf32> to vector<8x8x8xf32>
    %14 = arith.maximumf %11, %13 : vector<8x8x8xf32>
    %15 = vector.extract_strided_slice %14 {offsets = [0, 0, 0], sizes = [8, 8, 4], strides = [1, 1, 1]} : vector<8x8x8xf32> to vector<8x8x4xf32>
    %16 = vector.extract_strided_slice %14 {offsets = [0, 0, 4], sizes = [8, 8, 4], strides = [1, 1, 1]} : vector<8x8x8xf32> to vector<8x8x4xf32>
    %17 = arith.maximumf %15, %16 : vector<8x8x4xf32>
    %18 = arith.truncf %17 : vector<8x8x4xf32> to vector<8x8x4xbf16>
    %c1 = arith.constant 1 : index
    %c1_18 = arith.constant 1 : index
    %c0_19 = arith.constant 0 : index
    %19 = vector.load %arg7[%c1, %c1_18, %c0_19] : memref<10x16x8xbf16, #tpu.memory_space<vmem>>, vector<8x8x4xbf16>
    tpu.vector_store %arg7[%c1, %c1_18, %c0_19], %18 {strides = array<i32>} : memref<10x16x8xbf16, #tpu.memory_space<vmem>>, vector<8x8x4xbf16>,
    %cst_20 = arith.constant 0.000000e+00 : f32
    %20 = vector.broadcast %cst_20 : f32 to vector<64x8xf32>
    %c0_21 = arith.constant 0 : index
    %c0_22 = arith.constant 0 : index
    %c0_23 = arith.constant 0 : index
    %21 = vector.load %arg7[%c0_21, %c0_22, %c0_23] : memref<10x16x8xbf16, #tpu.memory_space<vmem>>, vector<8x8x4xbf16>
    %22 = vector.shape_cast %21 : vector<8x8x4xbf16> to vector<64x4xbf16>
    %c0_24 = arith.constant 0 : index
    %c0_25 = arith.constant 0 : index
    %23 = vector.load %arg2[%c0_24, %c0_25] : memref<36x8xbf16, #tpu.memory_space<vmem>>, vector<4x8xbf16>
    %cst_26 = arith.constant dense<0.000000e+00> : vector<64x8xf32>
    %24 = tpu.matmul %22, %23, %cst_26 {dimension_numbers = #tpu.dot_dimension_numbers<[1], [0], [0], [1], [0, 0, 1, 1], [], []>} : vector<64x4xbf16>, vector<4x8xbf16>, vector<64x8xf32> -> vector<64x8xf32>
    %25 = arith.addf %20, %24 : vector<64x8xf32>
    %c0_27 = arith.constant 0 : index
    %c1_28 = arith.constant 1 : index
    %c0_29 = arith.constant 0 : index
    %26 = vector.load %arg7[%c0_27, %c1_28, %c0_29] : memref<10x16x8xbf16, #tpu.memory_space<vmem>>, vector<8x8x4xbf16>
    %27 = vector.shape_cast %26 : vector<8x8x4xbf16> to vector<64x4xbf16>
    %c4 = arith.constant 4 : index
    %c0_30 = arith.constant 0 : index
    %28 = vector.load %arg2[%c4, %c0_30] : memref<36x8xbf16, #tpu.memory_space<vmem>>, vector<4x8xbf16>
    %cst_31 = arith.constant dense<0.000000e+00> : vector<64x8xf32>
    %29 = tpu.matmul %27, %28, %cst_31 {dimension_numbers = #tpu.dot_dimension_numbers<[1], [0], [0], [1], [0, 0, 1, 1], [], []>} : vector<64x4xbf16>, vector<4x8xbf16>, vector<64x8xf32> -> vector<64x8xf32>
    %30 = arith.addf %25, %29 : vector<64x8xf32>
    %c0_32 = arith.constant 0 : index
    %c2 = arith.constant 2 : index
    %c0_33 = arith.constant 0 : index
    %31 = vector.load %arg7[%c0_32, %c2, %c0_33] : memref<10x16x8xbf16, #tpu.memory_space<vmem>>, vector<8x8x4xbf16>
    %32 = vector.shape_cast %31 : vector<8x8x4xbf16> to vector<64x4xbf16>
    %c8 = arith.constant 8 : index
    %c0_34 = arith.constant 0 : index
    %33 = vector.load %arg2[%c8, %c0_34] : memref<36x8xbf16, #tpu.memory_space<vmem>>, vector<4x8xbf16>
    %cst_35 = arith.constant dense<0.000000e+00> : vector<64x8xf32>
    %34 = tpu.matmul %32, %33, %cst_35 {dimension_numbers = #tpu.dot_dimension_numbers<[1], [0], [0], [1], [0, 0, 1, 1], [], []>} : vector<64x4xbf16>, vector<4x8xbf16>, vector<64x8xf32> -> vector<64x8xf32>
    %35 = arith.addf %30, %34 : vector<64x8xf32>
    %c1_36 = arith.constant 1 : index
    %c0_37 = arith.constant 0 : index
    %c0_38 = arith.constant 0 : index
    %36 = vector.load %arg7[%c1_36, %c0_37, %c0_38] : memref<10x16x8xbf16, #tpu.memory_space<vmem>>, vector<8x8x4xbf16>
    %37 = vector.shape_cast %36 : vector<8x8x4xbf16> to vector<64x4xbf16>
    %c12 = arith.constant 12 : index
    %c0_39 = arith.constant 0 : index
    %38 = vector.load %arg2[%c12, %c0_39] : memref<36x8xbf16, #tpu.memory_space<vmem>>, vector<4x8xbf16>
    %cst_40 = arith.constant dense<0.000000e+00> : vector<64x8xf32>
    %39 = tpu.matmul %37, %38, %cst_40 {dimension_numbers = #tpu.dot_dimension_numbers<[1], [0], [0], [1], [0, 0, 1, 1], [], []>} : vector<64x4xbf16>, vector<4x8xbf16>, vector<64x8xf32> -> vector<64x8xf32>
    %40 = arith.addf %35, %39 : vector<64x8xf32>
    %c1_41 = arith.constant 1 : index
    %c1_42 = arith.constant 1 : index
    %c0_43 = arith.constant 0 : index
    %41 = vector.load %arg7[%c1_41, %c1_42, %c0_43] : memref<10x16x8xbf16, #tpu.memory_space<vmem>>, vector<8x8x4xbf16>
    %42 = vector.shape_cast %41 : vector<8x8x4xbf16> to vector<64x4xbf16>
    %c16 = arith.constant 16 : index
    %c0_44 = arith.constant 0 : index
    %43 = vector.load %arg2[%c16, %c0_44] : memref<36x8xbf16, #tpu.memory_space<vmem>>, vector<4x8xbf16>
    %cst_45 = arith.constant dense<0.000000e+00> : vector<64x8xf32>
    %44 = tpu.matmul %42, %43, %cst_45 {dimension_numbers = #tpu.dot_dimension_numbers<[1], [0], [0], [1], [0, 0, 1, 1], [], []>} : vector<64x4xbf16>, vector<4x8xbf16>, vector<64x8xf32> -> vector<64x8xf32>
    %45 = arith.addf %40, %44 : vector<64x8xf32>
    %c1_46 = arith.constant 1 : index
    %c2_47 = arith.constant 2 : index
    %c0_48 = arith.constant 0 : index
    %46 = vector.load %arg7[%c1_46, %c2_47, %c0_48] : memref<10x16x8xbf16, #tpu.memory_space<vmem>>, vector<8x8x4xbf16>
    %47 = vector.shape_cast %46 : vector<8x8x4xbf16> to vector<64x4xbf16>
    %c20 = arith.constant 20 : index
    %c0_49 = arith.constant 0 : index
    %48 = vector.load %arg2[%c20, %c0_49] : memref<36x8xbf16, #tpu.memory_space<vmem>>, vector<4x8xbf16>
    %cst_50 = arith.constant dense<0.000000e+00> : vector<64x8xf32>
    %49 = tpu.matmul %47, %48, %cst_50 {dimension_numbers = #tpu.dot_dimension_numbers<[1], [0], [0], [1], [0, 0, 1, 1], [], []>} : vector<64x4xbf16>, vector<4x8xbf16>, vector<64x8xf32> -> vector<64x8xf32>
    %50 = arith.addf %45, %49 : vector<64x8xf32>
    %c2_51 = arith.constant 2 : index
    %c0_52 = arith.constant 0 : index
    %c0_53 = arith.constant 0 : index
    %51 = vector.load %arg7[%c2_51, %c0_52, %c0_53] : memref<10x16x8xbf16, #tpu.memory_space<vmem>>, vector<8x8x4xbf16>
    %52 = vector.shape_cast %51 : vector<8x8x4xbf16> to vector<64x4xbf16>
    %c24 = arith.constant 24 : index
    %c0_54 = arith.constant 0 : index
    %53 = vector.load %arg2[%c24, %c0_54] : memref<36x8xbf16, #tpu.memory_space<vmem>>, vector<4x8xbf16>
    %cst_55 = arith.constant dense<0.000000e+00> : vector<64x8xf32>
    %54 = tpu.matmul %52, %53, %cst_55 {dimension_numbers = #tpu.dot_dimension_numbers<[1], [0], [0], [1], [0, 0, 1, 1], [], []>} : vector<64x4xbf16>, vector<4x8xbf16>, vector<64x8xf32> -> vector<64x8xf32>
    %55 = arith.addf %50, %54 : vector<64x8xf32>
    %c2_56 = arith.constant 2 : index
    %c1_57 = arith.constant 1 : index
    %c0_58 = arith.constant 0 : index
    %56 = vector.load %arg7[%c2_56, %c1_57, %c0_58] : memref<10x16x8xbf16, #tpu.memory_space<vmem>>, vector<8x8x4xbf16>
    %57 = vector.shape_cast %56 : vector<8x8x4xbf16> to vector<64x4xbf16>
    %c28 = arith.constant 28 : index
    %c0_59 = arith.constant 0 : index
    %58 = vector.load %arg2[%c28, %c0_59] : memref<36x8xbf16, #tpu.memory_space<vmem>>, vector<4x8xbf16>
    %cst_60 = arith.constant dense<0.000000e+00> : vector<64x8xf32>
    %59 = tpu.matmul %57, %58, %cst_60 {dimension_numbers = #tpu.dot_dimension_numbers<[1], [0], [0], [1], [0, 0, 1, 1], [], []>} : vector<64x4xbf16>, vector<4x8xbf16>, vector<64x8xf32> -> vector<64x8xf32>
    %60 = arith.addf %55, %59 : vector<64x8xf32>
    %c2_61 = arith.constant 2 : index
    %c2_62 = arith.constant 2 : index
    %c0_63 = arith.constant 0 : index
    %61 = vector.load %arg7[%c2_61, %c2_62, %c0_63] : memref<10x16x8xbf16, #tpu.memory_space<vmem>>, vector<8x8x4xbf16>
    %62 = vector.shape_cast %61 : vector<8x8x4xbf16> to vector<64x4xbf16>
    %c32 = arith.constant 32 : index
    %c0_64 = arith.constant 0 : index
    %63 = vector.load %arg2[%c32, %c0_64] : memref<36x8xbf16, #tpu.memory_space<vmem>>, vector<4x8xbf16>
    %cst_65 = arith.constant dense<0.000000e+00> : vector<64x8xf32>
    %64 = tpu.matmul %62, %63, %cst_65 {dimension_numbers = #tpu.dot_dimension_numbers<[1], [0], [0], [1], [0, 0, 1, 1], [], []>} : vector<64x4xbf16>, vector<4x8xbf16>, vector<64x8xf32> -> vector<64x8xf32>
    %65 = arith.addf %60, %64 : vector<64x8xf32>
    %c0_66 = arith.constant 0 : index
    %c0_67 = arith.constant 0 : index
    %66 = vector.load %arg3[%c0_66, %c0_67] : memref<1x8xf32, #tpu.memory_space<vmem>>, vector<1x8xf32>
    %67 = vector.broadcast %66 : vector<1x8xf32> to vector<64x8xf32>
    %68 = arith.addf %65, %67 : vector<64x8xf32>
    %cst_68 = arith.constant 0.000000e+00 : f32
    %69 = vector.broadcast %cst_68 : f32 to vector<64x8xf32>
    %70 = arith.maximumf %68, %69 : vector<64x8xf32>
    %71 = vector.shape_cast %70 : vector<64x8xf32> to vector<8x8x8xf32>
    %72 = arith.truncf %71 : vector<8x8x8xf32> to vector<8x8x8xbf16>
    %c1_69 = arith.constant 1 : index
    %c1_70 = arith.constant 1 : index
    %c0_71 = arith.constant 0 : index
    %73 = vector.load %arg7[%c1_69, %c1_70, %c0_71] : memref<10x16x8xbf16, #tpu.memory_space<vmem>>, vector<8x8x8xbf16>
    tpu.vector_store %arg7[%c1_69, %c1_70, %c0_71], %72 {strides = array<i32>} : memref<10x16x8xbf16, #tpu.memory_space<vmem>>, vector<8x8x8xbf16>,
    %cst_72 = arith.constant 0.000000e+00 : f32
    %74 = vector.broadcast %cst_72 : f32 to vector<64x8xf32>
    %c0_73 = arith.constant 0 : index
    %c0_74 = arith.constant 0 : index
    %c0_75 = arith.constant 0 : index
    %75 = vector.load %arg7[%c0_73, %c0_74, %c0_75] : memref<10x16x8xbf16, #tpu.memory_space<vmem>>, vector<8x8x8xbf16>
    %76 = vector.shape_cast %75 : vector<8x8x8xbf16> to vector<64x8xbf16>
    %c0_76 = arith.constant 0 : index
    %c0_77 = arith.constant 0 : index
    %77 = vector.load %arg4[%c0_76, %c0_77] : memref<72x8xbf16, #tpu.memory_space<vmem>>, vector<8x8xbf16>
    %cst_78 = arith.constant dense<0.000000e+00> : vector<64x8xf32>
    %78 = tpu.matmul %76, %77, %cst_78 {dimension_numbers = #tpu.dot_dimension_numbers<[1], [0], [0], [1], [0, 0, 1, 1], [], []>} : vector<64x8xbf16>, vector<8x8xbf16>, vector<64x8xf32> -> vector<64x8xf32>
    %79 = arith.addf %74, %78 : vector<64x8xf32>
    %c0_79 = arith.constant 0 : index
    %c1_80 = arith.constant 1 : index
    %c0_81 = arith.constant 0 : index
    %80 = vector.load %arg7[%c0_79, %c1_80, %c0_81] : memref<10x16x8xbf16, #tpu.memory_space<vmem>>, vector<8x8x8xbf16>
    %81 = vector.shape_cast %80 : vector<8x8x8xbf16> to vector<64x8xbf16>
    %c8_82 = arith.constant 8 : index
    %c0_83 = arith.constant 0 : index
    %82 = vector.load %arg4[%c8_82, %c0_83] : memref<72x8xbf16, #tpu.memory_space<vmem>>, vector<8x8xbf16>
    %cst_84 = arith.constant dense<0.000000e+00> : vector<64x8xf32>
    %83 = tpu.matmul %81, %82, %cst_84 {dimension_numbers = #tpu.dot_dimension_numbers<[1], [0], [0], [1], [0, 0, 1, 1], [], []>} : vector<64x8xbf16>, vector<8x8xbf16>, vector<64x8xf32> -> vector<64x8xf32>
    %84 = arith.addf %79, %83 : vector<64x8xf32>
    %c0_85 = arith.constant 0 : index
    %c2_86 = arith.constant 2 : index
    %c0_87 = arith.constant 0 : index
    %85 = vector.load %arg7[%c0_85, %c2_86, %c0_87] : memref<10x16x8xbf16, #tpu.memory_space<vmem>>, vector<8x8x8xbf16>
    %86 = vector.shape_cast %85 : vector<8x8x8xbf16> to vector<64x8xbf16>
    %c16_88 = arith.constant 16 : index
    %c0_89 = arith.constant 0 : index
    %87 = vector.load %arg4[%c16_88, %c0_89] : memref<72x8xbf16, #tpu.memory_space<vmem>>, vector<8x8xbf16>
    %cst_90 = arith.constant dense<0.000000e+00> : vector<64x8xf32>
    %88 = tpu.matmul %86, %87, %cst_90 {dimension_numbers = #tpu.dot_dimension_numbers<[1], [0], [0], [1], [0, 0, 1, 1], [], []>} : vector<64x8xbf16>, vector<8x8xbf16>, vector<64x8xf32> -> vector<64x8xf32>
    %89 = arith.addf %84, %88 : vector<64x8xf32>
    %c1_91 = arith.constant 1 : index
    %c0_92 = arith.constant 0 : index
    %c0_93 = arith.constant 0 : index
    %90 = vector.load %arg7[%c1_91, %c0_92, %c0_93] : memref<10x16x8xbf16, #tpu.memory_space<vmem>>, vector<8x8x8xbf16>
    %91 = vector.shape_cast %90 : vector<8x8x8xbf16> to vector<64x8xbf16>
    %c24_94 = arith.constant 24 : index
    %c0_95 = arith.constant 0 : index
    %92 = vector.load %arg4[%c24_94, %c0_95] : memref<72x8xbf16, #tpu.memory_space<vmem>>, vector<8x8xbf16>
    %cst_96 = arith.constant dense<0.000000e+00> : vector<64x8xf32>
    %93 = tpu.matmul %91, %92, %cst_96 {dimension_numbers = #tpu.dot_dimension_numbers<[1], [0], [0], [1], [0, 0, 1, 1], [], []>} : vector<64x8xbf16>, vector<8x8xbf16>, vector<64x8xf32> -> vector<64x8xf32>
    %94 = arith.addf %89, %93 : vector<64x8xf32>
    %c1_97 = arith.constant 1 : index
    %c1_98 = arith.constant 1 : index
    %c0_99 = arith.constant 0 : index
    %95 = vector.load %arg7[%c1_97, %c1_98, %c0_99] : memref<10x16x8xbf16, #tpu.memory_space<vmem>>, vector<8x8x8xbf16>
    %96 = vector.shape_cast %95 : vector<8x8x8xbf16> to vector<64x8xbf16>
    %c32_100 = arith.constant 32 : index
    %c0_101 = arith.constant 0 : index
    %97 = vector.load %arg4[%c32_100, %c0_101] : memref<72x8xbf16, #tpu.memory_space<vmem>>, vector<8x8xbf16>
    %cst_102 = arith.constant dense<0.000000e+00> : vector<64x8xf32>
    %98 = tpu.matmul %96, %97, %cst_102 {dimension_numbers = #tpu.dot_dimension_numbers<[1], [0], [0], [1], [0, 0, 1, 1], [], []>} : vector<64x8xbf16>, vector<8x8xbf16>, vector<64x8xf32> -> vector<64x8xf32>
    %99 = arith.addf %94, %98 : vector<64x8xf32>
    %c1_103 = arith.constant 1 : index
    %c2_104 = arith.constant 2 : index
    %c0_105 = arith.constant 0 : index
    %100 = vector.load %arg7[%c1_103, %c2_104, %c0_105] : memref<10x16x8xbf16, #tpu.memory_space<vmem>>, vector<8x8x8xbf16>
    %101 = vector.shape_cast %100 : vector<8x8x8xbf16> to vector<64x8xbf16>
    %c40 = arith.constant 40 : index
    %c0_106 = arith.constant 0 : index
    %102 = vector.load %arg4[%c40, %c0_106] : memref<72x8xbf16, #tpu.memory_space<vmem>>, vector<8x8xbf16>
    %cst_107 = arith.constant dense<0.000000e+00> : vector<64x8xf32>
    %103 = tpu.matmul %101, %102, %cst_107 {dimension_numbers = #tpu.dot_dimension_numbers<[1], [0], [0], [1], [0, 0, 1, 1], [], []>} : vector<64x8xbf16>, vector<8x8xbf16>, vector<64x8xf32> -> vector<64x8xf32>
    %104 = arith.addf %99, %103 : vector<64x8xf32>
    %c2_108 = arith.constant 2 : index
    %c0_109 = arith.constant 0 : index
    %c0_110 = arith.constant 0 : index
    %105 = vector.load %arg7[%c2_108, %c0_109, %c0_110] : memref<10x16x8xbf16, #tpu.memory_space<vmem>>, vector<8x8x8xbf16>
    %106 = vector.shape_cast %105 : vector<8x8x8xbf16> to vector<64x8xbf16>
    %c48 = arith.constant 48 : index
    %c0_111 = arith.constant 0 : index
    %107 = vector.load %arg4[%c48, %c0_111] : memref<72x8xbf16, #tpu.memory_space<vmem>>, vector<8x8xbf16>
    %cst_112 = arith.constant dense<0.000000e+00> : vector<64x8xf32>
    %108 = tpu.matmul %106, %107, %cst_112 {dimension_numbers = #tpu.dot_dimension_numbers<[1], [0], [0], [1], [0, 0, 1, 1], [], []>} : vector<64x8xbf16>, vector<8x8xbf16>, vector<64x8xf32> -> vector<64x8xf32>
    %109 = arith.addf %104, %108 : vector<64x8xf32>
    %c2_113 = arith.constant 2 : index
    %c1_114 = arith.constant 1 : index
    %c0_115 = arith.constant 0 : index
    %110 = vector.load %arg7[%c2_113, %c1_114, %c0_115] : memref<10x16x8xbf16, #tpu.memory_space<vmem>>, vector<8x8x8xbf16>
    %111 = vector.shape_cast %110 : vector<8x8x8xbf16> to vector<64x8xbf16>
    %c56 = arith.constant 56 : index
    %c0_116 = arith.constant 0 : index
    %112 = vector.load %arg4[%c56, %c0_116] : memref<72x8xbf16, #tpu.memory_space<vmem>>, vector<8x8xbf16>
    %cst_117 = arith.constant dense<0.000000e+00> : vector<64x8xf32>
    %113 = tpu.matmul %111, %112, %cst_117 {dimension_numbers = #tpu.dot_dimension_numbers<[1], [0], [0], [1], [0, 0, 1, 1], [], []>} : vector<64x8xbf16>, vector<8x8xbf16>, vector<64x8xf32> -> vector<64x8xf32>
    %114 = arith.addf %109, %113 : vector<64x8xf32>
    %c2_118 = arith.constant 2 : index
    %c2_119 = arith.constant 2 : index
    %c0_120 = arith.constant 0 : index
    %115 = vector.load %arg7[%c2_118, %c2_119, %c0_120] : memref<10x16x8xbf16, #tpu.memory_space<vmem>>, vector<8x8x8xbf16>
    %116 = vector.shape_cast %115 : vector<8x8x8xbf16> to vector<64x8xbf16>
    %c64 = arith.constant 64 : index
    %c0_121 = arith.constant 0 : index
    %117 = vector.load %arg4[%c64, %c0_121] : memref<72x8xbf16, #tpu.memory_space<vmem>>, vector<8x8xbf16>
    %cst_122 = arith.constant dense<0.000000e+00> : vector<64x8xf32>
    %118 = tpu.matmul %116, %117, %cst_122 {dimension_numbers = #tpu.dot_dimension_numbers<[1], [0], [0], [1], [0, 0, 1, 1], [], []>} : vector<64x8xbf16>, vector<8x8xbf16>, vector<64x8xf32> -> vector<64x8xf32>
    %119 = arith.addf %114, %118 : vector<64x8xf32>
    %c0_123 = arith.constant 0 : index
    %c0_124 = arith.constant 0 : index
    %120 = vector.load %arg5[%c0_123, %c0_124] : memref<1x8xf32, #tpu.memory_space<vmem>>, vector<1x8xf32>
    %121 = vector.broadcast %120 : vector<1x8xf32> to vector<64x8xf32>
    %122 = arith.addf %119, %121 : vector<64x8xf32>
    %cst_125 = arith.constant 0.000000e+00 : f32
    %123 = vector.broadcast %cst_125 : f32 to vector<64x8xf32>
    %124 = arith.maximumf %122, %123 : vector<64x8xf32>
    %125 = vector.shape_cast %124 : vector<64x8xf32> to vector<8x8x8xf32>
    %c0_126 = arith.constant 0 : index
    %c0_127 = arith.constant 0 : index
    %c0_128 = arith.constant 0 : index
    %c0_129 = arith.constant 0 : index
    %126 = vector.load %arg6[%c0_126, %c0_127, %c0_128, %c0_129] : memref<1x8x8x8xf32, #tpu.memory_space<vmem>>, vector<1x8x8x8xf32>
    %127 = vector.shape_cast %126 : vector<1x8x8x8xf32> to vector<8x8x8xf32>
    %128 = vector.shape_cast %125 : vector<8x8x8xf32> to vector<1x8x8x8xf32>
    tpu.vector_store %arg6[%c0_126, %c0_127, %c0_128, %c0_129], %128 {strides = array<i32>} : memref<1x8x8x8xf32, #tpu.memory_space<vmem>>, vector<1x8x8x8xf32>,
    return
  }
  func.func @transform_0(%arg0: i32) -> (i32, i32, i32, i32, i32) {
    %c0_i32 = arith.constant 0 : i32
    %c0_i32_0 = arith.constant 0 : i32
    %c0_i32_1 = arith.constant 0 : i32
    %c0_i32_2 = arith.constant 0 : i32
    %c0_i32_3 = arith.constant 0 : i32
    return %arg0, %c0_i32, %c0_i32_0, %c0_i32_1, %c0_i32_2 : i32, i32, i32, i32, i32
  }
  func.func @transform_1(%arg0: i32) -> (i32, i32) {
    %c0_i32 = arith.constant 0 : i32
    %c0_i32_0 = arith.constant 0 : i32
    %c0_i32_1 = arith.constant 0 : i32
    return %c0_i32, %c0_i32_0 : i32, i32
  }
  func.func @transform_2(%arg0: i32) -> (i32, i32) {
    %c0_i32 = arith.constant 0 : i32
    %c0_i32_0 = arith.constant 0 : i32
    %c0_i32_1 = arith.constant 0 : i32
    return %c0_i32, %c0_i32_0 : i32, i32
  }
  func.func @transform_3(%arg0: i32) -> (i32, i32) {
    %c0_i32 = arith.constant 0 : i32
    %c0_i32_0 = arith.constant 0 : i32
    %c0_i32_1 = arith.constant 0 : i32
    return %c0_i32, %c0_i32_0 : i32, i32
  }
  func.func @transform_4(%arg0: i32) -> (i32, i32) {
    %c0_i32 = arith.constant 0 : i32
    %c0_i32_0 = arith.constant 0 : i32
    %c0_i32_1 = arith.constant 0 : i32
    return %c0_i32, %c0_i32_0 : i32, i32
  }
  func.func @transform_5(%arg0: i32) -> (i32, i32, i32, i32) {
    %c0_i32 = arith.constant 0 : i32
    %c0_i32_0 = arith.constant 0 : i32
    %c0_i32_1 = arith.constant 0 : i32
    %c0_i32_2 = arith.constant 0 : i32
    return %arg0, %c0_i32, %c0_i32_0, %c0_i32_1 : i32, i32, i32, i32
  }
}

</mosaic_0001>

<bundles_post_ra>
// kernel: encoder_forward.1
= control target key start
LH: loop header
LB: loop body
LE: loop exit
PB: predicated region body
PF: predicated region fallthrough
CT: control target
= control target key end

     0   :  { %s4417_s18 = smov 0   ;;  %s5564_s0 = inlined_call_operand.vmem [shape: f32[2,8,2,8,8], index: 0, kind: input, shape index: {}]   ;;  %s5565_s1 = inlined_call_operand.vmem [shape: bf16[36,8], index: 1, kind: input, shape index: {}]   ;;  %s5566_s2 = inlined_call_operand.vmem [shape: f32[1,8], index: 2, kind: input, shape index: {}]   ;;  %s5567_s3 = inlined_call_operand.vmem [shape: bf16[72,8], index: 3, kind: input, shape index: {}]   ;;  %s5568_s4 = inlined_call_operand.vmem [shape: f32[1,8], index: 4, kind: input, shape index: {}]   ;;  %s5569_s5 = inlined_call_operand.vmem [shape: f32[2,8,8,8], index: 5, kind: output, shape index: {}]  }
   0x1 LB: > { %s3793_s19 = sadd.s32 4294967295, %s4383_s18   ;;  %p3797_p0 = scmp.ge.s32.totalorder %s4383_s18, 1  ;;  %s4383_s18 = sphi %s4417_s18, %s15_s18  }
   0x2   : > { %p187_p1 = scmp.lt.s32.totalorder %s4383_s18, 3 }
   0x4   : > { %p188_p2 = pnand %p3797_p0, %p187_p1 }
   0x6   : > { %191 = sbr.rel (%p188_p2) target bundleno = 783 (0x30f), region = 40 }
   0xb   : > { %p215_p3 = scmp.lt.s32.totalorder %s3793_s19, 1  ;;  %vm232_vm0 = vcmask 57344   ;;  %vm233_vm1 = vsmask.f32 256  ;;  %v5577_v0 = vmov 0  ;;  %vm226_vm5 = vcmask 60416  }
   0xc   : > { %vm4426_vm2 = vmand %vm232_vm0, %vm233_vm1  ;;  %v247_v1 = vld [vmem:[#allocation2 + $0x20] sm:$0x1]  ;;  %v250_v2 = vld [vmem:[#allocation2 + $0x28] sm:$0x1]  ;;  %vm265_vm3 = vsmask.f32 7938 }
   0xd   : > { %v5578_v0 = vsel %vm4426_vm2, 4294967295, %v5577_v0  ;;  %s5618_s19 = smov (!%p215_p3, %s3793_s19), 1  ;;  %v248_v3 = vsel %vm4426_vm2, 0, %v247_v1  ;;  %v251_v4 = vsel %vm4426_vm2, 0, %v250_v2  ;;  %vm4437_vm4 = vmand %vm232_vm0, %vm265_vm3  ;;  %v279_v6 = vld [vmem:[#allocation2 + $0x24] sm:$0x1] }
   0xe   : > { %5579 = vst [vmem:[#allocation3_spill] sm:$0xff] %v5578_v0  ;;  %249 = vst [vmem:[#allocation2 + $0x20] sm:$0x1] %v248_v3  ;;  %v280_v7 = vsel %vm4437_vm4, 0, %v279_v6  ;;  %v282_v8 = vld [vmem:[#allocation2 + $0x2c] sm:$0x1] }
   0xf   : > { %252 = vst [vmem:[#allocation2 + $0x28] sm:$0x1] %v251_v4  ;;  %v238_v9 = vld [vmem:[#allocation2 + $0x8] sm:$0x1]  ;;  %s4018_s20 = sshll.u32 %s5618_s19, 7  ;;  %v283_v10 = vsel %vm4437_vm4, 0, %v282_v8 }
  0x10   : > { %281 = vst [vmem:[#allocation2 + $0x24] sm:$0x1] %v280_v7  ;;  %v239_v11 = vsel %vm4426_vm2, 0, %v238_v9  ;;  %v241_v12 = vld [vmem:[#allocation2 + $0x10] sm:$0x1]  ;;  %s4451_s23 = scalar_lea.vmem %s5564_s0, %s4018_s20  ;;  %v4385_v39 = vmov 0  }
  0x11   : > { %284 = vst [vmem:[#allocation2 + $0x2c] sm:$0x1] %v283_v10  ;;  %240 = vst [vmem:[#allocation2 + $0x8] sm:$0x1] %v239_v11  ;;  %v242_v13 = vsel %vm4426_vm2, 0, %v241_v12  ;;  %v303_v16 = vld [vmem:[%s4451_s23 + $0x30] sm:$0xff] }
  0x12   : > { %v270_v14 = vld [vmem:[#allocation2 + $0xc] sm:$0x1]  ;;  %v273_v15 = vld [vmem:[#allocation2 + $0x14] sm:$0x1]  ;;  %v304_v17 = vld [vmem:[%s4451_s23 + $0x38] sm:$0xff]  ;;  %s4386_s24 = smov 124  }
  0x13   : > { %v305_v18 = vld [vmem:[%s4451_s23 + $0x40] sm:$0xff]  ;;  %243 = vst [vmem:[#allocation2 + $0x10] sm:$0x1] %v242_v13  ;;  %v271_v19 = vsel %vm4437_vm4, 0, %v270_v14  ;;  %v274_v20 = vsel %vm4437_vm4, 0, %v273_v15  ;;  %v306_v21 = vld [vmem:[%s4451_s23 + $0x48] sm:$0xff]  ;;  %v4463_v22 = vmax.f32 %v303_v16, %v304_v17 }
  0x14   : > { %v297_v23 = vld [vmem:[%s4451_s23] sm:$0xff]  ;;  %v298_v24 = vld [vmem:[%s4451_s23 + $0x8] sm:$0xff]  ;;  %272 = vst [vmem:[#allocation2 + $0xc] sm:$0x1] %v271_v19  ;;  %275 = vst [vmem:[#allocation2 + $0x14] sm:$0x1] %v274_v20  ;;  %v4467_v25 = vmax.f32 %v305_v18, %v306_v21 }
  0x15   : > { %v299_v26 = vld [vmem:[%s4451_s23 + $0x10] sm:$0xff]  ;;  %v300_v27 = vld [vmem:[%s4451_s23 + $0x18] sm:$0xff]  ;;  %v4471_v28 = vmax.f32 %v297_v23, %v298_v24  ;;  %v309_v32 = vld [vmem:[%s4451_s23 + $0x60] sm:$0xff]  ;;  %227 = vst.msk [vmem:[#allocation2] sm:$0xf] %vm226_vm5, %v4385_v39  ;;  %vm688_vm6 = vcmask 1041408  }
  0x16   : > { %v307_v29 = vld [vmem:[%s4451_s23 + $0x50] sm:$0xff]  ;;  %v4474_v30 = vmax.f32 %v299_v26, %v300_v27  ;;  %v308_v31 = vld [vmem:[%s4451_s23 + $0x58] sm:$0xff]  ;;  %v310_v33 = vld [vmem:[%s4451_s23 + $0x68] sm:$0xff]  ;;  %v4339_v34 = vpack.i.bf16 %v4467_v25, %v4463_v22  ;;  %230 = vst.msk [vmem:[#allocation2 + $0x48] sm:$0xf] %vm226_vm5, %v4385_v39  ;;  %vm881_vm8 = vcmask 1042432  }
  0x17   : > { %v4481_v35 = vmax.f32 %v307_v29, %v308_v31  ;;  %v4483_v36 = vmax.f32 %v309_v32, %v310_v33  ;;  %v301_v37 = vld [vmem:[%s4451_s23 + $0x20] sm:$0xff]  ;;  %v302_v38 = vld [vmem:[%s4451_s23 + $0x28] sm:$0xff]  ;;  %231 = vst.msk [vmem:[#allocation2 + $0x4c] sm:$0xf] %vm226_vm5, %v4385_v39  ;;  %228 = vst.msk [vmem:[#allocation2 + $0x4] sm:$0xf] %vm226_vm5, %v4385_v39 }
  0x18   : > { %v4334_v40 = vpack.i.bf16 %v4474_v30, %v4471_v28  ;;  %4340 = vrot.lane.b32.xlu1 %v4339_v34, %s4386_s24  ;;  %v4497_v42 = vmax.f32 %v301_v37, %v302_v38  ;;  %v253_v43 = vld [vmem:[#allocation2 + $0x30] sm:$0x1]  ;;  %v256_v44 = vld [vmem:[#allocation2 + $0x38] sm:$0x1]  ;;  %v285_v49 = vld [vmem:[#allocation2 + $0x34] sm:$0x1] }
  0x19   : > { %v4344_v41 = vpack.i.bf16 %v4483_v36, %v4481_v35  ;;  %v311_v45 = vld [vmem:[%s4451_s23 + $0x70] sm:$0xff]  ;;  %v312_v46 = vld [vmem:[%s4451_s23 + $0x78] sm:$0xff]  ;;  %v254_v47 = vsel %vm4426_vm2, 0, %v253_v43  ;;  %v257_v48 = vsel %vm4426_vm2, 0, %v256_v44  ;;  %v286_v52 = vsel %vm4437_vm4, 0, %v285_v49  ;;  %s4019_s17 = sshll.u32 %s5618_s19, 6 }
  0x1a   : > { %4335 = vrot.lane.b32.xlu0 %v4334_v40, %s4386_s24  ;;  %255 = vst [vmem:[#allocation2 + $0x30] sm:$0x1] %v254_v47  ;;  %258 = vst [vmem:[#allocation2 + $0x38] sm:$0x1] %v257_v48  ;;  %v288_v50 = vld [vmem:[#allocation2 + $0x3c] sm:$0x1]  ;;  %v4514_v56 = vmax.f32 %v311_v45, %v312_v46  ;;  %s5542_s22 = scalar_lea.vmem %s5569_s5, %s4019_s17 }
  0x1b   : > { %v244_v51 = vld [vmem:[#allocation2 + $0x18] sm:$0x1]  ;;  %v289_v53 = vsel %vm4437_vm4, 0, %v288_v50  ;;  %v276_v55 = vld [vmem:[#allocation2 + $0x1c] sm:$0x1]  ;;  %vm882_vm9 = vcmask 1046532  }
  0x1c   : > { %4345 = vrot.lane.b32.xlu1 %v4344_v41, %s4386_s24  ;;  %v245_v54 = vsel %vm4426_vm2, 0, %v244_v51  ;;  %287 = vst [vmem:[#allocation2 + $0x34] sm:$0x1] %v286_v52  ;;  %290 = vst [vmem:[#allocation2 + $0x3c] sm:$0x1] %v289_v53  ;;  %v277_v57 = vsel %vm4437_vm4, 0, %v276_v55 }
  0x1d   : > { %246 = vst [vmem:[#allocation2 + $0x18] sm:$0x1] %v245_v54  ;;  %v259_v58 = vld [vmem:[#allocation2 + $0x40] sm:$0x1]  ;;  %v291_v59 = vld [vmem:[#allocation2 + $0x44] sm:$0x1]  ;;  %vm4563_vm11 = vmor %vm881_vm8, %vm882_vm9 }
  0x1e   : > { %333 = vrot.lane.b32.xlu0 %v4497_v42, %s4386_s24  ;;  %278 = vst [vmem:[#allocation2 + $0x1c] sm:$0x1] %v277_v57  ;;  %v260_v60 = vsel %vm4426_vm2, 0, %v259_v58  ;;  %v292_v61 = vsel %vm4437_vm4, 0, %v291_v59  ;;  %v235_v62 = vld [vmem:[#allocation2] sm:$0x1] }
  0x1f   : > { %261 = vst [vmem:[#allocation2 + $0x40] sm:$0x1] %v260_v60  ;;  %293 = vst [vmem:[#allocation2 + $0x44] sm:$0x1] %v292_v61  ;;  %v236_v63 = vsel %vm4426_vm2, 0, %v235_v62  ;;  %v5582_v32 = vmov 0 }
  0x20   : > { %v267_v1 = vld [vmem:[#allocation2 + $0x4] sm:$0x1]  ;;  %237 = vst [vmem:[#allocation2] sm:$0x1] %v236_v63  ;;  %v534_v3 = vld [vmem:[%s5565_s1] sm:$0x3] }
  0x21   : > { %v268_v2 = vsel %vm4437_vm4, 0, %v267_v1  ;;  %v294_v4 = vld [vmem:[#allocation2 + $0x4c] sm:$0x1]  ;;  %4307 = vmatprep.subr.msk.bf16.mxu1 %vm688_vm6, %v534_v3  ;;  %v790_v6 = vsel %vm688_vm6, %v534_v3, 0  ;;  %v916_v11 = vld [vmem:[%s5565_s1 + $0x4] sm:$0x3] }
  0x22   : > { %343 = vrot.lane.b32.xlu0 %v4514_v56, %s4386_s24  ;;  %269 = vst [vmem:[#allocation2 + $0x4] sm:$0x1] %v268_v2  ;;  %v295_v7 = vsel %vm4437_vm4, 0, %v294_v4  ;;  %4137 = vmatpush3.bf16.msra.mxu1 %v790_v6  ;;  %v4352_v8 = vld [vmem:[%s5565_s1] ss:$0 sps:$4 sm:$0xcc]  }
  0x23   : > { %296 = vst [vmem:[#allocation2 + $0x4c] sm:$0x1] %v295_v7  ;;  %v674_v9 = vrot.slane %v4352_v8, 2  ;;  %v4355_v5 = vld [vmem:[%s5565_s1 + $0x4] ss:$0 sps:$4 sm:$0xcc]  }
  0x24   : > { %v1049_v12 = vrot.slane %v4355_v5, 2  ;;  %v262_v13 = vld [vmem:[#allocation2 + $0x48] sm:$0x1]  ;;  %vm543_vm7 = vsmask.f32 3328  ;;  %v5583_v32 = vsel %vm4563_vm11, 4294967295, %v5582_v32 }
  0x25   : > { %4306 = vmatprep.subr.msk.bf16.mxu0 %vm688_vm6, %v674_v9  ;;  %v690_v10 = vsel %vm688_vm6, %v674_v9, 0  ;;  %v263_v14 = vsel %vm4426_vm2, 0, %v262_v13  ;;  %v857_v24 = vld [vmem:[#allocation2] sm:$0xe]  ;;  %vm544_vm10 = vsmask.f32 7440 }
  0x26   : > { %4127 = vmatpush3.bf16.msra.mxu0 %v690_v10  ;;  %4309 = vmatprep.subr.msk.bf16.mxu1 %vm688_vm6, %v1049_v12  ;;  %264 = vst [vmem:[#allocation2 + $0x48] sm:$0x1] %v263_v14  ;;  %v4557_v26 = vld [vmem:[%s5565_s1 + $0x8] ss:$0 sps:$4 sm:$0xcc]   ;;  %5584 = vst [vmem:[#allocation4_spill] sm:$0xff] %v5583_v32 }
  0x27   : > { %4308 = vmatprep.subr.msk.bf16.mxu0 %vm688_vm6, %v916_v11  ;;  %v4550_v15 = vld [vmem:[#allocation2] sm:$0xf]  ;;  %v3827_v33 = vrot.slane %v857_v24, 9  ;;  %vm4567_vm12 = vmor %vm543_vm7, %vm544_vm10  ;;  %v1439_v38 = vrot.slane %v4557_v26, 2  ;;  %vm474_vm13 = vcmask 27648   ;;  %vm479_vm14 = vcmask 24576  }
  0x28   : > { %v547_v16 = vshrl.u32 %v4550_v15, 16  ;;  %v550_v17 = vshll.u32 %v4550_v15, 16  ;;  %v4575_v43 = vld [vmem:[%s5565_s1 + $0x8] sm:$0x3]  ;;  %v4593_v51 = vsel %vm688_vm6, %v916_v11, 0  ;;  %v4596_v52 = vsel %vm688_vm6, %v1049_v12, 0  ;;  %vm4615_vm15 = vmand %vm474_vm13, %vm265_vm3 }
  0x29   : > { %v535_v20 = vld [vmem:[#allocation2 + $0x4] sm:$0x1]  ;;  %v4588_v48 = vld [vmem:[%s5565_s1 + $0xc] ss:$0 sps:$4 sm:$0xcc]   ;;  %v4602_v57 = vsel %vm688_vm6, %v4575_v43, 0  ;;  %vm4622_vm0 = vmand %vm479_vm14, %vm233_vm1 }
  0x2a   : > { %v549_v18 = vrot.slane %v547_v16, 4  ;;  %v552_v19 = vrot.slane %v550_v17, 5  ;;  %v556_v23 = vshll.u32 %v535_v20, 16  ;;  %v886_v31 = vrot.slane %v535_v20, 5  ;;  %v496_v6 = vld [vmem:[#allocation2 + $0x20] sm:$0xf] }
  0x2b   : > { %v499_v7 = vld [vmem:[#allocation2 + $0x24] sm:$0x1]  ;;  %v502_v5 = vld [vmem:[#allocation2 + $0x28] sm:$0xf]  ;;  %v505_v12 = vld [vmem:[#allocation2 + $0x2c] sm:$0x1] }
  0x2c   : > { %v553_v21 = vor.u32 %v552_v19, %v549_v18  ;;  %v4561_v29 = vrot.slane %v556_v23, 5  ;;  %v4583_v47 = vsel %vm4563_vm11, %v3827_v33, %v886_v31  ;;  %v476_v19 = vld [vmem:[#allocation2 + $0x8] sm:$0xf]  ;;  %v484_v20 = vld [vmem:[#allocation2 + $0x10] sm:$0xf]  ;;  %vm675_vm1 = vcmask 31744  }
  0x2d   : > { %vm2375_vm4 = vcmask 1043456  }
  0x2e   : > { %v4559_v27 = vrot.slane %v553_v21, 4 }
  0x30   : > { %v559_v46 = vsel %vm4567_vm12, %v4559_v27, %v4561_v29 }
  0x8a   : > { %v4341_v37 = vpop.permute.xlu1 %4340 }
  0x8b   : > { %v4343_v39 = vunpack.i.h.bf16 %v4341_v37  ;;  %v4342_v40 = vunpack.i.l.bf16 %v4341_v37 }
  0x8c   : > { %v4336_v41 = vpop.permute.xlu0 %4335 }
  0x8d   : > { %v4338_v44 = vunpack.i.h.bf16 %v4336_v41  ;;  %v4337_v45 = vunpack.i.l.bf16 %v4336_v41  ;;  %v357_v49 = vmax.f32 %v4467_v25, %v4343_v39  ;;  %v356_v50 = vmax.f32 %v4463_v22, %v4342_v40  ;;  %v481_v40 = vld [vmem:[#allocation2 + $0xc] sm:$0x1]  ;;  %v487_v41 = vld [vmem:[#allocation2 + $0x14] sm:$0x1] }
  0x8e   : > { %v4346_v55 = vpop.permute.xlu1 %4345  ;;  %v4607_v25 = vsel %vm688_vm6, %v1439_v38, 0 }
  0x8f   : > { %v354_v53 = vmax.f32 %v4474_v30, %v4338_v44  ;;  %v353_v54 = vmax.f32 %v4471_v28, %v4337_v45  ;;  %v4024_v22 = vpack.c.bf16 %v357_v49, %v357_v49  ;;  %v4023_v58 = vpack.c.bf16 %v356_v50, %v356_v50 }
  0x90   : > { %v4348_v59 = vunpack.i.h.bf16 %v4346_v55  ;;  %v4347_v60 = vunpack.i.l.bf16 %v4346_v55  ;;  %v334_v61 = vpop.permute.xlu0 %333  ;;  %v1790_v28 = vrot.slane %v4588_v48, 2 }
  0x91   : > { %v4021_v62 = vpack.c.bf16 %v354_v53, %v354_v53  ;;  %v4020_v63 = vpack.c.bf16 %v353_v54, %v353_v54  ;;  %v355_v30 = vmax.f32 %v4497_v42, %v334_v61  ;;  %v426_v1 = vshrl.u32 %v4024_v22, 16  ;;  %v1660_v53 = vld [vmem:[#allocation2 + $0x48] sm:$0xf] }
  0x92   : > { %v429_v2 = vshll.u32 %v4024_v22, 16  ;;  %v418_v3 = vshrl.u32 %v4023_v58, 16  ;;  %v421_v4 = vshll.u32 %v4023_v58, 16  ;;  %v359_v16 = vmax.f32 %v4483_v36, %v4348_v59  ;;  %v4637_v58 = vld [vmem:[%s5565_s1 + $0xc] sm:$0x3] }
  0x93   : > { %v402_v8 = vshrl.u32 %v4021_v62, 16  ;;  %v405_v9 = vshll.u32 %v4021_v62, 16  ;;  %v394_v10 = vshrl.u32 %v4020_v63, 16  ;;  %v397_v11 = vshll.u32 %v4020_v63, 16 }
  0x94   : > { %v428_v13 = vrot.slane %v426_v1, 7  ;;  %v420_v14 = vrot.slane %v418_v3, 7  ;;  %v358_v42 = vmax.f32 %v4481_v35, %v4347_v60  ;;  %v344_v17 = vpop.permute.xlu0 %343  ;;  %v4022_v24 = vpack.c.bf16 %v355_v30, %v355_v30 }
  0x95   : > { %v404_v21 = vrot.slane %v402_v8, 7  ;;  %v396_v23 = vrot.slane %v394_v10, 7  ;;  %v360_v31 = vmax.f32 %v4514_v56, %v344_v17  ;;  %v4026_v63 = vpack.c.bf16 %v359_v16, %v359_v16  ;;  %v517_v16 = vld [vmem:[#allocation2 + $0x3c] sm:$0x1] }
  0x96   : > { %v431_v35 = vor.u32 %v429_v2, %v428_v13  ;;  %v432_v33 = vrot.slane %v428_v13, 4  ;;  %v423_v37 = vor.u32 %v421_v4, %v420_v14  ;;  %v424_v39 = vrot.slane %v420_v14, 4  ;;  %v511_v13 = vld [vmem:[#allocation2 + $0x34] sm:$0x1]  ;;  %v514_v14 = vld [vmem:[#allocation2 + $0x38] sm:$0xf] }
  0x97   : > { %v407_v44 = vor.u32 %v405_v9, %v404_v21  ;;  %v408_v45 = vrot.slane %v404_v21, 4  ;;  %v399_v49 = vor.u32 %v397_v11, %v396_v23  ;;  %v400_v50 = vrot.slane %v396_v23, 4  ;;  %v4656_v21 = vld [vmem:[#allocation2 + $0x4c] sm:$0x1] }
  0x98   : > { %v503_v56 = vsel %vm4615_vm15, %v431_v35, %v502_v5  ;;  %v506_v54 = vsel %vm4622_vm0, %v432_v33, %v505_v12  ;;  %v497_v55 = vsel %vm4615_vm15, %v423_v37, %v496_v6  ;;  %v500_v22 = vsel %vm4622_vm0, %v424_v39, %v499_v7  ;;  %v490_v5 = vld [vmem:[#allocation2 + $0x18] sm:$0xf]  ;;  %v508_v12 = vld [vmem:[#allocation2 + $0x30] sm:$0xf]  ;;  %v493_v35 = vld [vmem:[#allocation2 + $0x1c] sm:$0x1] }
  0x99   : > { %504 = vst [vmem:[#allocation2 + $0x28] sm:$0xf] %v503_v56  ;;  %507 = vst [vmem:[#allocation2 + $0x2c] sm:$0x1] %v506_v54  ;;  %v485_v59 = vsel %vm4615_vm15, %v407_v44, %v484_v20  ;;  %v488_v60 = vsel %vm4622_vm0, %v408_v45, %v487_v41  ;;  %v477_v61 = vsel %vm4615_vm15, %v399_v49, %v476_v19  ;;  %v410_v1 = vshrl.u32 %v4022_v24, 16 }
  0x9a   : > { %498 = vst [vmem:[#allocation2 + $0x20] sm:$0xf] %v497_v55  ;;  %501 = vst [vmem:[#allocation2 + $0x24] sm:$0x1] %v500_v22  ;;  %v482_v62 = vsel %vm4622_vm0, %v400_v50, %v481_v40  ;;  %v4025_v30 = vpack.c.bf16 %v358_v42, %v358_v42  ;;  %v1761_v2 = vshrl.u32 %v1660_v53, 16  ;;  %v4027_v3 = vpack.c.bf16 %v360_v31, %v360_v31 }
  0x9b   : > { %486 = vst [vmem:[#allocation2 + $0x10] sm:$0xf] %v485_v59  ;;  %489 = vst [vmem:[#allocation2 + $0x14] sm:$0x1] %v488_v60  ;;  %v4649_v4 = vsel %vm688_vm6, %v4637_v58, 0  ;;  %v4654_v6 = vsel %vm688_vm6, %v1790_v28, 0 }
  0x9c   : > { %478 = vst [vmem:[#allocation2 + $0x8] sm:$0xf] %v477_v61  ;;  %483 = vst [vmem:[#allocation2 + $0xc] sm:$0x1] %v482_v62  ;;  %v1764_v7 = vshll.u32 %v1660_v53, 16  ;;  %v442_v8 = vshrl.u32 %v4026_v63, 16 }
  0x9d   : > { %v445_v9 = vshll.u32 %v4026_v63, 16  ;;  %v434_v10 = vshrl.u32 %v4025_v30, 16  ;;  %v437_v11 = vshll.u32 %v4025_v30, 16  ;;  %v412_v42 = vrot.slane %v410_v1, 7  ;;  %v520_v41 = vld [vmem:[#allocation2 + $0x40] sm:$0xf] }
  0x9e   : > { %v413_v17 = vshll.u32 %v4022_v24, 16  ;;  %v450_v19 = vshrl.u32 %v4027_v3, 16  ;;  %v453_v20 = vshll.u32 %v4027_v3, 16  ;;  %v444_v23 = vrot.slane %v442_v8, 7  ;;  %v523_v56 = vld [vmem:[#allocation2 + $0x44] sm:$0x1] }
  0x9f   : > { %v436_v31 = vrot.slane %v434_v10, 7  ;;  %v4658_v33 = vrot.slane %v1761_v2, 4  ;;  %v1770_v37 = vshll.u32 %v4656_v21, 16  ;;  %v416_v40 = vrot.slane %v412_v42, 4 }
  0xa0   : > { %v415_v39 = vor.u32 %v413_v17, %v412_v42  ;;  %v452_v44 = vrot.slane %v450_v19, 7  ;;  %v4661_v45 = vrot.slane %v1764_v7, 5  ;;  %v447_v49 = vor.u32 %v445_v9, %v444_v23  ;;  %v4677_v3 = vld [vmem:[#allocation2 + $0x28] sm:$0xf] }
  0xa1   : > { %v448_v50 = vrot.slane %v444_v23, 4  ;;  %v439_v24 = vor.u32 %v437_v11, %v436_v31  ;;  %v440_v53 = vrot.slane %v436_v31, 4  ;;  %v4663_v54 = vld [vmem:[#allocation2 + $0x20] sm:$0xf]  ;;  %v494_v22 = vsel %vm4622_vm0, %v416_v40, %v493_v35 }
  0xa2   : > { %v491_v55 = vsel %vm4615_vm15, %v415_v39, %v490_v5  ;;  %v455_v59 = vor.u32 %v453_v20, %v452_v44  ;;  %v456_v60 = vrot.slane %v452_v44, 4  ;;  %v528_v62 = vld [vmem:[#allocation2 + $0x10] sm:$0xf]  ;;  %v515_v63 = vsel %vm4615_vm15, %v447_v49, %v514_v14  ;;  %495 = vst [vmem:[#allocation2 + $0x1c] sm:$0x1] %v494_v22 }
  0xa3   : > { %v527_v61 = vld [vmem:[#allocation2 + $0x8] sm:$0xf]  ;;  %v518_v30 = vsel %vm4622_vm0, %v448_v50, %v517_v16  ;;  %v509_v1 = vsel %vm4615_vm15, %v439_v24, %v508_v12  ;;  %v512_v2 = vsel %vm4622_vm0, %v440_v53, %v511_v13  ;;  %492 = vst [vmem:[#allocation2 + $0x18] sm:$0xf] %v491_v55  ;;  %516 = vst [vmem:[#allocation2 + $0x38] sm:$0xf] %v515_v63 }
  0xa4   : > { %519 = vst [vmem:[#allocation2 + $0x3c] sm:$0x1] %v518_v30  ;;  %510 = vst [vmem:[#allocation2 + $0x30] sm:$0xf] %v509_v1  ;;  %v521_v7 = vsel %vm4615_vm15, %v455_v59, %v520_v41  ;;  %v524_v8 = vsel %vm4622_vm0, %v456_v60, %v523_v56  ;;  %v561_v9 = vshrl.u32 %v527_v61, 16  ;;  %v564_v10 = vshll.u32 %v527_v61, 16 }
  0xa5   : > { %513 = vst [vmem:[#allocation2 + $0x34] sm:$0x1] %v512_v2  ;;  %v4683_v11 = vld [vmem:[#allocation2 + $0xc] sm:$0x1]  ;;  %522 = vst [vmem:[#allocation2 + $0x40] sm:$0xf] %v521_v7  ;;  %v3819_v5 = vcombine.low %v4550_v15, %v527_v61  ;;  %v1767_v17 = vor.u32 %v4661_v45, %v4658_v33  ;;  %v3821_v56 = vcombine.low %v4663_v54, %v4677_v3 }
  0xa6   : > { %525 = vst [vmem:[#allocation2 + $0x44] sm:$0x1] %v524_v8  ;;  %v575_v12 = vshrl.u32 %v528_v62, 16  ;;  %v578_v13 = vshll.u32 %v528_v62, 16  ;;  %v603_v14 = vshrl.u32 %v4663_v54, 16  ;;  %v606_v18 = vshll.u32 %v4663_v54, 16 }
  0xa7   : > { %v4687_v16 = vld [vmem:[#allocation2 + $0x14] sm:$0x1]  ;;  %v617_v42 = vshrl.u32 %v4677_v3, 16  ;;  %v620_v36 = vshll.u32 %v4677_v3, 16  ;;  %4138 = vmatprep.mubr.msk.bf16.mxu1 %vm675_vm1, %v3819_v5  ;;  %v563_v19 = vrot.slane %v561_v9, 4  ;;  %v566_v20 = vrot.slane %v564_v10, 5 }
  0xa8   : > { %v570_v15 = vshll.u32 %v4683_v11, 16  ;;  %v890_v23 = vrot.slane %v4683_v11, 5  ;;  %v577_v31 = vrot.slane %v575_v12, 4  ;;  %v580_v35 = vrot.slane %v578_v13, 5  ;;  %v4699_v49 = vld [vmem:[#allocation2 + $0x24] sm:$0x1] }
  0xa9   : > { %v584_v39 = vshll.u32 %v4687_v16, 16  ;;  %v894_v40 = vrot.slane %v4687_v16, 5  ;;  %v567_v41 = vor.u32 %v566_v20, %v563_v19  ;;  %v605_v50 = vrot.slane %v603_v14, 4  ;;  %v4703_v55 = vld [vmem:[#allocation2 + $0x1c] sm:$0x1] }
  0xaa   : > { %v572_v44 = vrot.slane %v570_v15, 5  ;;  %v608_v24 = vrot.slane %v606_v18, 5  ;;  %v529_v53 = vld [vmem:[#allocation2 + $0x18] sm:$0xf]  ;;  %v581_v22 = vor.u32 %v580_v35, %v577_v31  ;;  %v612_v60 = vshll.u32 %v4699_v49, 16 }
  0xab   : > { %v586_v59 = vrot.slane %v584_v39, 5  ;;  %v589_v61 = vshrl.u32 %v529_v53, 16  ;;  %v592_v63 = vshll.u32 %v529_v53, 16  ;;  %v3820_v30 = vcombine.low %v528_v62, %v529_v53  ;;  %v532_v2 = vld [vmem:[#allocation2 + $0x30] sm:$0xf] }
  0xac   : > { %v568_v1 = vrot.slane %v567_v41, 4  ;;  %v533_v7 = vld [vmem:[#allocation2 + $0x38] sm:$0xf]  ;;  %v631_v8 = vshrl.u32 %v532_v2, 16  ;;  %v634_v9 = vshll.u32 %v532_v2, 16  ;;  %v582_v10 = vrot.slane %v581_v22, 4 }
  0xad   : > { %v598_v5 = vshll.u32 %v4703_v55, 16  ;;  %4139 = vmatmul.mubr.msk.bf16.vlgmr.msra.gmra.mxu1 %vm675_vm1, %v3820_v30  ;;  %v645_v3 = vshrl.u32 %v533_v7, 16  ;;  %v648_v12 = vshll.u32 %v533_v7, 16  ;;  %v3822_v13 = vcombine.low %v532_v2, %v533_v7  ;;  %v4718_v20 = vld [vmem:[#allocation2 + $0x2c] sm:$0x1] }
  0xae   : > { %v573_v54 = vsel %vm4567_vm12, %v568_v1, %v572_v44  ;;  %4142 = vmatprep.mubr.msk.bf16.mxu1 %vm675_vm1, %v3821_v56  ;;  %v587_v14 = vsel %vm4567_vm12, %v582_v10, %v586_v59  ;;  %v591_v18 = vrot.slane %v589_v61, 4  ;;  %v594_v19 = vrot.slane %v592_v63, 5  ;;  %4157 = vmatpush3.bf16.msra.mxu1 %v4596_v52  ;;  %v858_v41 = vld [vmem:[#allocation2 + $0x8] sm:$0xe]  ;;  %v4727_v53 = vld [vmem:[#allocation2 + $0x34] sm:$0x1] }
  0xaf   : > { %v3810_v62 = vcombine.low %v559_v46, %v573_v54  ;;  %v600_v15 = vrot.slane %v598_v5, 5  ;;  %v898_v31 = vrot.slane %v4703_v55, 5  ;;  %v609_v35 = vor.u32 %v608_v24, %v605_v50  ;;  %4311 = vmatprep.subr.msk.bf16.mxu1 %vm688_vm6, %v1439_v38  ;;  %v4354_v55 = vld [vmem:[#allocation2 + $0x8] ss:$8 sps:$4 sm:$0xff]   ;;  %v4732_v61 = vld [vmem:[#allocation2 + $0x3c] sm:$0x1] }
  0xb0   : > { %v614_v39 = vrot.slane %v612_v60, 5  ;;  %v595_v27 = vor.u32 %v594_v19, %v591_v18  ;;  %v619_v29 = vrot.slane %v617_v42, 4  ;;  %v622_v46 = vrot.slane %v620_v36, 5  ;;  %v859_v30 = vld [vmem:[#allocation2 + $0x10] sm:$0xe] }
  0xb1   : > { %4128 = vmatprep.mubr.msk.bf16.mxu0 %vm675_vm1, %v3810_v62  ;;  %v626_v44 = vshll.u32 %v4718_v20, 16  ;;  %v610_v52 = vrot.slane %v609_v35, 4  ;;  %v633_v56 = vrot.slane %v631_v8, 4  ;;  %v636_v22 = vrot.slane %v634_v9, 5  ;;  %v860_v9 = vld [vmem:[#allocation2 + $0x18] sm:$0xe] }
  0xb2   : > { %v640_v50 = vshll.u32 %v4727_v53, 16  ;;  %v596_v24 = vrot.slane %v595_v27, 4  ;;  %v623_v59 = vor.u32 %v622_v46, %v619_v29  ;;  %v647_v60 = vrot.slane %v645_v3, 4  ;;  %v4738_v62 = vld [vmem:[#allocation2 + $0xc] sm:$0x1] }
  0xb3   : > { %v628_v26 = vrot.slane %v626_v44, 5  ;;  %v615_v38 = vsel %vm4567_vm12, %v610_v52, %v614_v39  ;;  %v637_v42 = vor.u32 %v636_v22, %v633_v56  ;;  %v650_v63 = vrot.slane %v648_v12, 5  ;;  %v4740_v18 = vld [vmem:[#allocation2 + $0x14] sm:$0x1]  ;;  %v1368_v35 = vld [vmem:[#allocation2 + $0x10] sm:$0xe] }
  0xb4   : > { %v642_v36 = vrot.slane %v640_v50, 5  ;;  %v601_v1 = vsel %vm4567_vm12, %v596_v24, %v600_v15  ;;  %v624_v2 = vrot.slane %v623_v59, 4  ;;  %v654_v7 = vshll.u32 %v4732_v61, 16  ;;  %v861_v46 = vld [vmem:[#allocation2 + $0x20] sm:$0xe] }
  0xb5   : > { %v3828_v8 = vrot.slane %v858_v41, 9  ;;  %4143 = vmatmul.mubr.msk.bf16.gmra.mxu1 %vm675_vm1, %v3822_v13  ;;  %v3811_v10 = vcombine.low %v587_v14, %v601_v1  ;;  %v638_v5 = vrot.slane %v637_v42, 4  ;;  %v651_v54 = vor.u32 %v650_v63, %v647_v60  ;;  %v1367_v14 = vld [vmem:[#allocation2 + $0x8] sm:$0xe]  ;;  %v4768_v22 = vld [vmem:[#allocation2 + $0x1c] sm:$0x1] }
  0xb6   : > { %v3829_v3 = vrot.slane %v859_v30, 9  ;;  %4158 = vmatprep.mubr.msk.bf16.mxu1 %vm675_vm1, %v4354_v55  ;;  %v629_v12 = vsel %vm4567_vm12, %v624_v2, %v628_v26  ;;  %v656_v19 = vrot.slane %v654_v7, 5  ;;  %v3830_v13 = vrot.slane %v860_v9, 9  ;;  %v862_v44 = vld [vmem:[#allocation2 + $0x28] sm:$0xe] }
  0xb7   : > { %v4749_v15 = vsel %vm4563_vm11, %v3828_v8, %v890_v23  ;;  %4129 = vmatmul.mubr.msk.bf16.vlgmr.msra.gmra.mxu0 %vm675_vm1, %v3811_v10  ;;  %v3812_v39 = vcombine.low %v615_v38, %v629_v12  ;;  %v643_v41 = vsel %vm4567_vm12, %v638_v5, %v642_v36  ;;  %v652_v27 = vrot.slane %v651_v54, 4  ;;  %v1369_v24 = vld [vmem:[#allocation2 + $0x18] sm:$0xe]  ;;  %v1370_v55 = vld [vmem:[#allocation2 + $0x20] sm:$0xe] }
  0xb8   : > { %v3835_v29 = vcombine.low %v4583_v47, %v4749_v15  ;;  %4147 = vmatpush3.bf16.msra.mxu0 %v4593_v51  ;;  %v4761_v11 = vsel %vm4563_vm11, %v3829_v3, %v894_v40  ;;  %v4765_v23 = vsel %vm4563_vm11, %v3830_v13, %v898_v31  ;;  %v3860_v52 = vrot.slane %v1367_v14, 9  ;;  %v4770_v47 = vld [vmem:[#allocation2 + $0x24] sm:$0x1]  ;;  %v4356_v51 = vld [vmem:[#allocation2 + $0x18] ss:$8 sps:$4 sm:$0xff]  }
  0xb9   : > { %v1393_v56 = vrot.slane %v4738_v62, 5  ;;  %4132 = vmatprep.mubr.msk.bf16.mxu0 %vm675_vm1, %v3812_v39  ;;  %v657_v16 = vsel %vm4567_vm12, %v652_v27, %v656_v19  ;;  %4310 = vmatprep.subr.msk.bf16.mxu0 %vm688_vm6, %v4575_v43  ;;  %v3836_v40 = vcombine.low %v4761_v11, %v4765_v23  ;;  %v3861_v31 = vrot.slane %v1368_v35, 9  ;;  %v4357_v26 = vld [vmem:[#allocation2 + $0x28] ss:$8 sps:$4 sm:$0xff]   ;;  %v864_v63 = vld [vmem:[#allocation2 + $0x38] sm:$0xe] }
  0xba   : > { %v1397_v50 = vrot.slane %v4740_v18, 5  ;;  %v3813_v59 = vcombine.low %v643_v41, %v657_v16  ;;  %v3831_v38 = vrot.slane %v861_v46, 9  ;;  %v902_v42 = vrot.slane %v4699_v49, 5  ;;  %v863_v36 = vld [vmem:[#allocation2 + $0x30] sm:$0xe] }
  0xbb   : > { %v4782_v60 = vsel %vm4563_vm11, %v3860_v52, %v1393_v56  ;;  %v3832_v30 = vrot.slane %v862_v44, 9  ;;  %v906_v1 = vrot.slane %v4718_v20, 5  ;;  %v3862_v2 = vrot.slane %v1369_v24, 9  ;;  %v4790_v7 = vld [vmem:[#allocation2 + $0x2c] sm:$0x1] }
  0xbc   : > { %v4787_v43 = vsel %vm4563_vm11, %v3861_v31, %v1397_v50  ;;  %v4796_v9 = vsel %vm4563_vm11, %v3831_v38, %v902_v42  ;;  %v1401_v49 = vrot.slane %v4768_v22, 5  ;;  %v3863_v10 = vrot.slane %v1370_v55, 9  ;;  %v4799_v5 = vld [vmem:[#allocation2 + $0x34] sm:$0x1]  ;;  %v1371_v54 = vld [vmem:[#allocation2 + $0x28] sm:$0xe] }
  0xbd   : > { %v3868_v8 = vcombine.low %v4782_v60, %v4787_v43  ;;  %4159 = vmatmul.mubr.msk.bf16.vlgmr.msra.gmra.mxu1 %vm675_vm1, %v4356_v51  ;;  %v4804_v20 = vsel %vm4563_vm11, %v3832_v30, %v906_v1  ;;  %v1405_v3 = vrot.slane %v4770_v47, 5  ;;  %v3833_v12 = vrot.slane %v863_v36, 9  ;;  %v1372_v15 = vld [vmem:[#allocation2 + $0x30] sm:$0xe]  ;;  %v4817_v41 = vld [vmem:[#allocation2 + $0x8] sm:$0xf] }
  0xbe   : > { %v910_v19 = vrot.slane %v4727_v53, 5  ;;  %4162 = vmatprep.mubr.msk.bf16.mxu1 %vm675_vm1, %v4357_v26  ;;  %v3837_v13 = vcombine.low %v4796_v9, %v4804_v20  ;;  %4177 = vmatpush3.bf16.msra.mxu1 %v4607_v25  ;;  %v4814_v14 = vsel %vm4563_vm11, %v3862_v2, %v1401_v49  ;;  %v3834_v35 = vrot.slane %v864_v63, 9  ;;  %5591 = vst [vmem:[#allocation5_spill] sm:$0xff] %v4817_v41  ;;  %v1140_v44 = vld [vmem:[#allocation2 + $0x10] sm:$0xf] }
  0xbf   : > { %v914_v39 = vrot.slane %v4732_v61, 5  ;;  %4133 = vmatmul.mubr.msk.bf16.gmra.mxu0 %vm675_vm1, %v3813_v59  ;;  %v4822_v53 = vsel %vm4563_vm11, %v3863_v10, %v1405_v3  ;;  %v3864_v25 = vrot.slane %v1371_v54, 9  ;;  %v1409_v46 = vrot.slane %v4790_v7, 5  ;;  %4313 = vmatprep.subr.msk.bf16.mxu1 %vm688_vm6, %v1790_v28  ;;  %v4840_v16 = vld [vmem:[#allocation2 + $0x3c] sm:$0x1] }
  0xc0   : > { %v4826_v27 = vsel %vm4563_vm11, %v3833_v12, %v910_v19  ;;  %4148 = vmatprep.mubr.msk.bf16.mxu0 %vm675_vm1, %v3835_v29  ;;  %v3869_v61 = vcombine.low %v4814_v14, %v4822_v53  ;;  %v3865_v56 = vrot.slane %v1372_v15, 9  ;;  %v1413_v51 = vrot.slane %v4799_v5, 5  ;;  %v4358_v31 = vld [vmem:[#allocation2 + $0x38] ss:$8 sps:$4 sm:$0xff]   ;;  %v4850_v24 = vld [vmem:[#allocation2 + $0x44] sm:$0x1] }
  0xc1   : > { %v4837_v52 = vsel %vm4563_vm11, %v3834_v35, %v914_v39  ;;  %v4846_v28 = vsel %vm4563_vm11, %v3864_v25, %v1409_v46  ;;  %v1155_v29 = vshrl.u32 %v4817_v41, 16  ;;  %v1158_v50 = vshll.u32 %v4817_v41, 16  ;;  %v1373_v55 = vld [vmem:[#allocation2 + $0x38] sm:$0xe]  ;;  %v1374_v42 = vld [vmem:[#allocation2 + $0x40] sm:$0xe] }
  0xc2   : > { %v3838_v48 = vcombine.low %v4826_v27, %v4837_v52  ;;  %v4854_v59 = vsel %vm4563_vm11, %v3865_v56, %v1413_v51  ;;  %v1164_v26 = vshll.u32 %v4738_v62, 16  ;;  %v1169_v60 = vshrl.u32 %v1140_v44, 16  ;;  %v1142_v1 = vld [vmem:[#allocation2 + $0x18] sm:$0xf]  ;;  %v1144_v54 = vld [vmem:[#allocation2 + $0x20] sm:$0xf] }
  0xc3   : > { %v1172_v38 = vshll.u32 %v1140_v44, 16  ;;  %v3870_v36 = vcombine.low %v4846_v28, %v4854_v59  ;;  %v1157_v63 = vrot.slane %v1155_v29, 4  ;;  %v1160_v43 = vrot.slane %v1158_v50, 5  ;;  %v1646_v56 = vld [vmem:[#allocation2 + $0x10] sm:$0xf] }
  0xc4   : > { %v1178_v30 = vshll.u32 %v4740_v18, 16  ;;  %v1166_v2 = vrot.slane %v1164_v26, 5  ;;  %v1171_v9 = vrot.slane %v1169_v60, 4  ;;  %v3866_v10 = vrot.slane %v1373_v55, 9  ;;  %v1648_v28 = vld [vmem:[#allocation2 + $0x18] sm:$0xf] }
  0xc5   : > { %v1174_v49 = vrot.slane %v1172_v38, 5  ;;  %4163 = vmatmul.mubr.msk.bf16.gmra.mxu1 %vm675_vm1, %v4358_v31  ;;  %v1161_v20 = vor.u32 %v1160_v43, %v1157_v63  ;;  %v1417_v3 = vrot.slane %v4840_v16, 5  ;;  %v3867_v12 = vrot.slane %v1374_v42, 9  ;;  %v4890_v60 = vld [vmem:[#allocation2 + $0x1c] sm:$0x1] }
  0xc6   : > { %v1180_v62 = vrot.slane %v1178_v30, 5  ;;  %4178 = vmatprep.mubr.msk.bf16.mxu1 %vm675_vm1, %v3868_v8  ;;  %v1421_v15 = vrot.slane %v4850_v24, 5  ;;  %v1183_v35 = vshrl.u32 %v1142_v1, 16  ;;  %v1186_v18 = vshll.u32 %v1142_v1, 16 }
  0xc7   : > { %v1175_v19 = vor.u32 %v1174_v49, %v1171_v9  ;;  %4149 = vmatmul.mubr.msk.bf16.vlgmr.msra.gmra.mxu0 %vm675_vm1, %v3836_v40  ;;  %v1162_v39 = vrot.slane %v1161_v20, 4  ;;  %v4870_v25 = vsel %vm4563_vm11, %v3866_v10, %v1417_v3  ;;  %v1192_v46 = vshll.u32 %v4768_v22, 16  ;;  %v4879_v40 = vld [vmem:[#allocation2 + $0x14] sm:$0x1] }
  0xc8   : > { %v1197_v44 = vshrl.u32 %v1144_v54, 16  ;;  %4167 = vmatpush3.bf16.msra.mxu0 %v4602_v57  ;;  %4152 = vmatprep.mubr.msk.bf16.mxu0 %vm675_vm1, %v3837_v13  ;;  %v4877_v51 = vsel %vm4563_vm11, %v3867_v12, %v1421_v15  ;;  %v1185_v11 = vrot.slane %v1183_v35, 4  ;;  %v1188_v23 = vrot.slane %v1186_v18, 5 }
  0xc9   : > { %v1176_v8 = vrot.slane %v1175_v19, 4  ;;  %v1167_v31 = vsel %vm4567_vm12, %v1162_v39, %v1166_v2  ;;  %v3871_v22 = vcombine.low %v4870_v25, %v4877_v51  ;;  %4312 = vmatprep.subr.msk.bf16.mxu0 %vm688_vm6, %v4637_v58  ;;  %v1194_v57 = vrot.slane %v1192_v46, 5  ;;  %v1146_v2 = vld [vmem:[#allocation2 + $0x28] sm:$0xf] }
  0xca   : > { %v1199_v13 = vrot.slane %v1197_v44, 4  ;;  %v1189_v50 = vor.u32 %v1188_v23, %v1185_v11  ;;  %v1200_v55 = vshll.u32 %v1144_v54, 16  ;;  %v1206_v59 = vshll.u32 %v4770_v47, 16  ;;  %v1148_v54 = vld [vmem:[#allocation2 + $0x30] sm:$0xf] }
  0xcb   : > { %v1181_v29 = vsel %vm4567_vm12, %v1176_v8, %v1180_v62  ;;  %v1663_v38 = vshrl.u32 %v1646_v56, 16  ;;  %v1666_v42 = vshll.u32 %v1646_v56, 16  ;;  %v1672_v63 = vshll.u32 %v4879_v40, 16  ;;  %v1650_v44 = vld [vmem:[#allocation2 + $0x20] sm:$0xf] }
  0xcc   : > { %v3852_v26 = vcombine.low %v1167_v31, %v1181_v29  ;;  %v1190_v43 = vrot.slane %v1189_v50, 4  ;;  %v1202_v30 = vrot.slane %v1200_v55, 5  ;;  %v1208_v58 = vrot.slane %v1206_v59, 5  ;;  %v4910_v8 = vld [vmem:[#allocation2 + $0x24] sm:$0x1] }
  0xcd   : > { %v1677_v1 = vshrl.u32 %v1648_v28, 16  ;;  %4179 = vmatmul.mubr.msk.bf16.vlgmr.msra.gmra.mxu1 %vm675_vm1, %v3869_v61  ;;  %v1665_v9 = vrot.slane %v1663_v38, 4  ;;  %v1668_v49 = vrot.slane %v1666_v42, 5  ;;  %v1674_v47 = vrot.slane %v1672_v63, 5  ;;  %v1652_v51 = vld [vmem:[#allocation2 + $0x28] sm:$0xf] }
  0xce   : > { %v1680_v10 = vshll.u32 %v1648_v28, 16  ;;  %4182 = vmatprep.mubr.msk.bf16.mxu1 %vm675_vm1, %v3870_v36  ;;  %v1195_v20 = vsel %vm4567_vm12, %v1190_v43, %v1194_v57  ;;  %v1203_v62 = vor.u32 %v1202_v30, %v1199_v13  ;;  %v1686_v12 = vshll.u32 %v4890_v60, 16  ;;  %4197 = vmatpush3.bf16.msra.mxu1 %v4654_v6  ;;  %v1150_v57 = vld [vmem:[#allocation2 + $0x38] sm:$0xf]  ;;  %v4918_v55 = vld [vmem:[%s5565_s1 + $0x10] sm:$0x3] }
  0xcf   : > { %v1679_v3 = vrot.slane %v1677_v1, 4  ;;  %4153 = vmatmul.mubr.msk.bf16.gmra.mxu0 %vm675_vm1, %v3838_v48  ;;  %v1669_v14 = vor.u32 %v1668_v49, %v1665_v9  ;;  %v1211_v61 = vshrl.u32 %v1146_v2, 16  ;;  %v1214_v19 = vshll.u32 %v1146_v2, 16  ;;  %v1152_v63 = vld [vmem:[#allocation2 + $0x40] sm:$0xf] }
  0xd0   : > { %v1682_v53 = vrot.slane %v1680_v10, 5  ;;  %4168 = vmatprep.mubr.msk.bf16.mxu0 %vm675_vm1, %v3852_v26  ;;  %v1204_v36 = vrot.slane %v1203_v62, 4  ;;  %v1688_v15 = vrot.slane %v1686_v12, 5  ;;  %v1220_v35 = vshll.u32 %v4790_v7, 16  ;;  %v4927_v2 = vld [vmem:[#allocation2 + $0x2c] sm:$0x1] }
  0xd1   : > { %v1225_v18 = vshrl.u32 %v1148_v54, 16  ;;  %v1670_v39 = vrot.slane %v1669_v14, 4  ;;  %v1213_v46 = vrot.slane %v1211_v61, 4  ;;  %v1216_v6 = vrot.slane %v1214_v19, 5 }
  0xd2   : > { %v1683_v25 = vor.u32 %v1682_v53, %v1679_v3  ;;  %v1209_v27 = vsel %vm4567_vm12, %v1204_v36, %v1208_v58  ;;  %v1222_v52 = vrot.slane %v1220_v35, 5  ;;  %v1228_v56 = vshll.u32 %v1148_v54, 16  ;;  %v1654_v36 = vld [vmem:[#allocation2 + $0x30] sm:$0xf] }
  0xd3   : > { %v1227_v48 = vrot.slane %v1225_v18, 4  ;;  %v3853_v11 = vcombine.low %v1195_v20, %v1209_v27  ;;  %v1675_v23 = vsel %vm4567_vm12, %v1670_v39, %v1674_v47  ;;  %v1217_v31 = vor.u32 %v1216_v6, %v1213_v46 }
  0xd4   : > { %v1684_v7 = vrot.slane %v1683_v25, 4  ;;  %v1230_v13 = vrot.slane %v1228_v56, 5  ;;  %v1234_v28 = vshll.u32 %v4799_v5, 16  ;;  %v1691_v29 = vshrl.u32 %v1650_v44, 16 }
  0xd5   : > { %v1694_v50 = vshll.u32 %v1650_v44, 16  ;;  %4183 = vmatmul.mubr.msk.bf16.gmra.mxu1 %vm675_vm1, %v3871_v22  ;;  %v1218_v26 = vrot.slane %v1217_v31, 4  ;;  %v1700_v38 = vshll.u32 %v4910_v8, 16  ;;  %v1705_v42 = vshrl.u32 %v1652_v51, 16  ;;  %v1656_v44 = vld [vmem:[#allocation2 + $0x38] sm:$0xf] }
  0xd6   : > { %v1689_v59 = vsel %vm4567_vm12, %v1684_v7, %v1688_v15  ;;  %v1231_v30 = vor.u32 %v1230_v13, %v1227_v48  ;;  %v1236_v5 = vrot.slane %v1234_v28, 5  ;;  %v1693_v58 = vrot.slane %v1691_v29, 4  ;;  %v4941_v48 = vld [vmem:[#allocation2 + $0x34] sm:$0x1]  ;;  %v1658_v29 = vld [vmem:[#allocation2 + $0x40] sm:$0xf] }
  0xd7   : > { %v3885_v43 = vcombine.low %v1675_v23, %v1689_v59  ;;  %4169 = vmatmul.mubr.msk.bf16.vlgmr.msra.gmra.mxu0 %vm675_vm1, %v3853_v11  ;;  %v1223_v1 = vsel %vm4567_vm12, %v1218_v26, %v1222_v52  ;;  %v1696_v22 = vrot.slane %v1694_v50, 5  ;;  %v1702_v9 = vrot.slane %v1700_v38, 5 }
  0xd8   : > { %v1707_v49 = vrot.slane %v1705_v42, 4  ;;  %4187 = vmatpush3.bf16.msra.mxu0 %v4649_v4  ;;  %v1232_v47 = vrot.slane %v1231_v30, 4  ;;  %v1708_v10 = vshll.u32 %v1652_v51, 16  ;;  %v1714_v54 = vshll.u32 %v4927_v2, 16 }
  0xd9   : > { %4198 = vmatprep.mubr.msk.bf16.mxu1 %vm675_vm1, %v3885_v43  ;;  %v1239_v20 = vshrl.u32 %v1150_v57, 16  ;;  %v1697_v62 = vor.u32 %v1696_v22, %v1693_v58  ;;  %v1242_v3 = vshll.u32 %v1150_v57, 16  ;;  %v1248_v12 = vshll.u32 %v4840_v16, 16  ;;  %4314 = vmatprep.subr.msk.bf16.mxu0 %vm688_vm6, %v4918_v55  ;;  %v4948_v43 = vld [vmem:[#allocation2 + $0x3c] sm:$0x1] }
  0xda   : > { %v1253_v14 = vshrl.u32 %v1152_v63, 16  ;;  %v1237_v53 = vsel %vm4567_vm12, %v1232_v47, %v1236_v5  ;;  %v1710_v61 = vrot.slane %v1708_v10, 5  ;;  %v1716_v4 = vrot.slane %v1714_v54, 5 }
  0xdb   : > { %v1241_v19 = vrot.slane %v1239_v20, 4  ;;  %v3854_v15 = vcombine.low %v1223_v1, %v1237_v53  ;;  %v1698_v35 = vrot.slane %v1697_v62, 4  ;;  %v1244_v18 = vrot.slane %v1242_v3, 5 }
  0xdc   : > { %v1250_v39 = vrot.slane %v1248_v12, 5  ;;  %v1711_v25 = vor.u32 %v1710_v61, %v1707_v49  ;;  %v1255_v46 = vrot.slane %v1253_v14, 4  ;;  %v1256_v6 = vshll.u32 %v1152_v63, 16 }
  0xdd   : > { %v1262_v16 = vshll.u32 %v4850_v24, 16  ;;  %4172 = vmatprep.mubr.msk.bf16.mxu0 %vm675_vm1, %v3854_v15  ;;  %v1703_v27 = vsel %vm4567_vm12, %v1698_v35, %v1702_v9  ;;  %v1245_v52 = vor.u32 %v1244_v18, %v1241_v19  ;;  %v1719_v56 = vshrl.u32 %v1654_v36, 16  ;;  %v4951_v9 = vld [vmem:[#allocation2 + $0x44] sm:$0x1]  ;;  %v4361_v15 = vld [vmem:[#allocation2 + $0x10] ss:$8 sps:$4 sm:$0xff]  }
  0xde   : > { %v1722_v51 = vshll.u32 %v1654_v36, 16  ;;  %v1712_v11 = vrot.slane %v1711_v25, 4  ;;  %v1258_v23 = vrot.slane %v1256_v6, 5  ;;  %v1728_v31 = vshll.u32 %v4941_v48, 16  ;;  %v4362_v6 = vld [vmem:[#allocation2 + $0x20] ss:$8 sps:$4 sm:$0xff]  }
  0xdf   : > { %v1264_v7 = vrot.slane %v1262_v16, 5  ;;  %v1246_v57 = vrot.slane %v1245_v52, 4  ;;  %v1721_v13 = vrot.slane %v1719_v56, 4  ;;  %v1733_v24 = vshrl.u32 %v1656_v44, 16 }
  0xe0   : > { %v1724_v28 = vrot.slane %v1722_v51, 5  ;;  %v1717_v50 = vsel %vm4567_vm12, %v1712_v11, %v1716_v4  ;;  %v1259_v59 = vor.u32 %v1258_v23, %v1255_v46  ;;  %v1730_v26 = vrot.slane %v1728_v31, 5  ;;  %v1880_v46 = vld [vmem:[#allocation2 + $0x18] sm:$0xe]  ;;  %v1881_v23 = vld [vmem:[#allocation2 + $0x20] sm:$0xe] }
  0xe1   : > { %v1736_v38 = vshll.u32 %v1656_v44, 16  ;;  %v3886_v42 = vcombine.low %v1703_v27, %v1717_v50  ;;  %v1251_v63 = vsel %vm4567_vm12, %v1246_v57, %v1250_v39  ;;  %v1735_v5 = vrot.slane %v1733_v24, 4  ;;  %v4363_v44 = vld [vmem:[#allocation2 + $0x30] ss:$8 sps:$4 sm:$0xff]  }
  0xe2   : > { %v1725_v30 = vor.u32 %v1724_v28, %v1721_v13  ;;  %v1260_v58 = vrot.slane %v1259_v59, 4  ;;  %v1742_v22 = vshll.u32 %v4948_v43, 16  ;;  %v1747_v49 = vshrl.u32 %v1658_v29, 16  ;;  %v1879_v27 = vld [vmem:[#allocation2 + $0x10] sm:$0xe] }
  0xe3   : > { %v1738_v1 = vrot.slane %v1736_v38, 5  ;;  %4199 = vmatmul.mubr.msk.bf16.vlgmr.msra.gmra.mxu1 %vm675_vm1, %v3886_v42  ;;  %v1750_v10 = vshll.u32 %v1658_v29, 16  ;;  %v1756_v54 = vshll.u32 %v4951_v9, 16  ;;  %v1768_v61 = vrot.slane %v1767_v17, 4  ;;  %v1883_v31 = vld [vmem:[#allocation2 + $0x30] sm:$0xe] }
  0xe4   : > { %v1726_v47 = vrot.slane %v1725_v30, 4  ;;  %v1265_v20 = vsel %vm4567_vm12, %v1260_v58, %v1264_v7  ;;  %v1744_v3 = vrot.slane %v1742_v22, 5  ;;  %v1749_v12 = vrot.slane %v1747_v49, 4  ;;  %v1884_v57 = vld [vmem:[#allocation2 + $0x38] sm:$0xe] }
  0xe5   : > { %v1739_v62 = vor.u32 %v1738_v1, %v1735_v5  ;;  %v3855_v14 = vcombine.low %v1251_v63, %v1265_v20  ;;  %v1752_v53 = vrot.slane %v1750_v10, 5  ;;  %v1772_v4 = vrot.slane %v1770_v37, 5  ;;  %v4364_v13 = vld [vmem:[#allocation2 + $0x40] ss:$8 sps:$4 sm:$0xff]  }
  0xe6   : > { %v1731_v19 = vsel %vm4567_vm12, %v1726_v47, %v1730_v26  ;;  %v1758_v18 = vrot.slane %v1756_v54, 5  ;;  %v1961_v16 = vsel %vm688_vm6, %v4918_v55, 0  ;;  %v3895_v52 = vrot.slane %v1880_v46, 9  ;;  %v1882_v55 = vld [vmem:[#allocation2 + $0x28] sm:$0xe]  ;;  %vm5169_vm6 = vmand %vm226_vm5, %vm265_vm3 }
  0xe7   : > { %v1740_v36 = vrot.slane %v1739_v62, 4  ;;  %4173 = vmatmul.mubr.msk.bf16.gmra.mxu0 %vm675_vm1, %v3855_v14  ;;  %v1753_v35 = vor.u32 %v1752_v53, %v1749_v12  ;;  %v1773_v45 = vsel %vm4567_vm12, %v1768_v61, %v1772_v4  ;;  %v1909_v56 = vrot.slane %v4890_v60, 5  ;;  %v1885_v5 = vld [vmem:[#allocation2 + $0x40] sm:$0xe]  ;;  %v1886_v58 = vld [vmem:[#allocation2 + $0x48] sm:$0xe] }
  0xe8   : > { %4188 = vmatprep.mubr.msk.bf16.mxu0 %vm675_vm1, %v4361_v15  ;;  %v3894_v51 = vrot.slane %v1879_v27, 9  ;;  %v1905_v11 = vrot.slane %v4879_v40, 5  ;;  %v3896_v24 = vrot.slane %v1881_v23, 9  ;;  %v1913_v60 = vrot.slane %v4910_v8, 5  ;;  %v5020_v12 = vld [vmem:[%s5567_s3 + $0x8] sm:$0xf] }
  0xe9   : > { %v1745_v39 = vsel %vm4567_vm12, %v1740_v36, %v1744_v3  ;;  %v1754_v33 = vrot.slane %v1753_v35, 4  ;;  %v1910_v7 = vsel %vm4563_vm11, %v3895_v52, %v1909_v56  ;;  %v3897_v50 = vrot.slane %v1882_v55, 9  ;;  %v5027_v53 = vld [vmem:[%s5567_s3 + $0xc] sm:$0xf] }
  0xea   : > { %v3887_v25 = vcombine.low %v1731_v19, %v1745_v39  ;;  %v1906_v28 = vsel %vm4563_vm11, %v3894_v51, %v1905_v11  ;;  %v1917_v59 = vrot.slane %v4927_v2, 5  ;;  %v3898_v40 = vrot.slane %v1883_v31, 9  ;;  %5592 = vst [vmem:[#allocation6_spill] sm:$0xff] %v5027_v53 }
  0xeb   : > { %v1759_v37 = vsel %vm4567_vm12, %v1754_v33, %v1758_v18  ;;  %v3902_v29 = vcombine.low %v1906_v28, %v1910_v7  ;;  %v1921_v26 = vrot.slane %v4941_v48, 5  ;;  %v3899_v38 = vrot.slane %v1884_v57, 9 }
  0xec   : > { %4202 = vmatprep.mubr.msk.bf16.mxu1 %vm675_vm1, %v3887_v25  ;;  %v3888_v17 = vcombine.low %v1759_v37, %v1773_v45  ;;  %v1925_v42 = vrot.slane %v4948_v43, 5  ;;  %v1914_v63 = vsel %vm4563_vm11, %v3896_v24, %v1913_v60  ;;  %v1918_v30 = vsel %vm4563_vm11, %v3897_v50, %v1917_v59 }
  0xed   : > { %v1922_v8 = vsel %vm4563_vm11, %v3898_v40, %v1921_v26  ;;  %v3903_v48 = vcombine.low %v1914_v63, %v1918_v30  ;;  %v1933_v1 = vrot.slane %v4656_v21, 5  ;;  %v3900_v22 = vrot.slane %v1885_v5, 9  ;;  %v2349_v21 = vld [vmem:[%s5567_s3 + $0x4] sm:$0xf] }
  0xee   : > { %4203 = vmatmul.mubr.msk.bf16.gmra.mxu1 %vm675_vm1, %v3888_v17  ;;  %v1926_v2 = vsel %vm4563_vm11, %v3899_v38, %v1925_v42  ;;  %v1929_v49 = vrot.slane %v4951_v9, 5  ;;  %v3901_v47 = vrot.slane %v1886_v58, 9  ;;  %v2228_v9 = vld [vmem:[%s5567_s3] sm:$0xf]  ;;  %4315 = vmatprep.subr.msk.bf16.mxu1 %vm2375_vm4, %v2349_v21  ;;  %v2377_v62 = vsel %vm2375_vm4, %v2349_v21, 0 }
  0xef   : > { %4189 = vmatmul.mubr.msk.bf16.vlgmr.msra.gmra.mxu0 %vm675_vm1, %v4362_v6  ;;  %v3904_v43 = vcombine.low %v1922_v8, %v1926_v2  ;;  %v2477_v3 = vsel %vm2375_vm4, %v2228_v9, 0  ;;  %4217 = vmatpush3.bf16.msra.mxu1 %v2377_v62  ;;  %vm2362_vm3 = vcmask 64512  }
  0xf0   : > { %4207 = vmatpush3.bf16.msra.mxu0 %v1961_v16  ;;  %4192 = vmatprep.mubr.msk.bf16.mxu0 %vm675_vm1, %v4363_v44  ;;  %v1930_v10 = vsel %vm4563_vm11, %v3900_v22, %v1929_v49  ;;  %v1934_v54 = vsel %vm4563_vm11, %v3901_v47, %v1933_v1  ;;  %v5065_v1 = vld [vmem:[#allocation2] sm:$0xf] }
  0xf1   : > { %v3905_v20 = vcombine.low %v1930_v10, %v1934_v54  ;;  %4316 = vmatprep.subr.msk.bf16.mxu0 %vm2375_vm4, %v2228_v9  ;;  %4317 = vmatprep.subr.msk.bf16.mxu1 %vm2375_vm4, %v5020_v12  ;;  %5597 = vst [vmem:[#allocation11_spill] sm:$0xff] %v5065_v1  ;;  %v2238_v47 = vshrl.u32 %v5065_v1, 16  ;;  %v2241_v10 = vshll.u32 %v5065_v1, 16 }
  0xf3   : > { %v2240_v41 = vrot.slane %v2238_v47, 4  ;;  %v2243_v0 = vrot.slane %v2241_v10, 5 }
  0xf7   : > { %4193 = vmatmul.mubr.msk.bf16.gmra.mxu0 %vm675_vm1, %v4364_v13 }
  0xf8   : > { %4208 = vmatprep.mubr.msk.bf16.mxu0 %vm675_vm1, %v3902_v29 }
  0xff   : > { %4209 = vmatmul.mubr.msk.bf16.vlgmr.msra.gmra.mxu0 %vm675_vm1, %v3903_v48 }
 0x100   : > { %4212 = vmatprep.mubr.msk.bf16.mxu0 %vm675_vm1, %v3904_v43  ;;  %4227 = vmatpush3.bf16.msra.mxu0 %v2477_v3 }
 0x101   : > { %4318 = vmatprep.subr.msk.bf16.mxu0 %vm2375_vm4, %v5027_v53 }
 0x107   : > { %4213 = vmatmul.mubr.msk.bf16.gmra.mxu0 %vm675_vm1, %v3905_v20 }
 0x16d   : > { %v4140_v14 = vpop.f32.mrf.mxu1 }
 0x16f   : > { %v826_v61 = vpop.f32.mrf.mxu1 }
 0x171   : > { %v4141_v4 = vpop.f32.mrf.mxu1 }
 0x173   : > { %v829_v19 = vpop.f32.mrf.mxu1 }
 0x175   : > { %v5031_v36 = vpop.f32.mrf.mxu1 }
 0x177   : > { %v4130_v15 = vpop.f32.mrf.mxu0  ;;  %v5033_v35 = vpop.f32.mrf.mxu1 }
 0x178   : > { %v835_v22 = vadd.f32 %v4140_v14, %v4130_v15 }
 0x179   : > { %v726_v18 = vpop.f32.mrf.mxu0  ;;  %v5035_v39 = vpop.f32.mrf.mxu1 }
 0x17a   : > { %v827_v20 = vadd.f32 %v826_v61, %v726_v18 }
 0x17b   : > { %v4131_v25 = vpop.f32.mrf.mxu0  ;;  %v5037_v33 = vpop.f32.mrf.mxu1 }
 0x17c   : > { %v838_v62 = vadd.f32 %v4141_v4, %v4131_v25 }
 0x17d   : > { %v729_v45 = vpop.f32.mrf.mxu0  ;;  %v4160_v37 = vpop.f32.mrf.mxu1 }
 0x17f   : > { %v4134_v17 = vpop.f32.mrf.mxu0  ;;  %v1099_v46 = vpop.f32.mrf.mxu1 }
 0x180   : > { %v851_v4 = vadd.f32 %v5031_v36, %v4134_v17 }
 0x181   : > { %v742_v6 = vpop.f32.mrf.mxu0  ;;  %v4161_v16 = vpop.f32.mrf.mxu1 }
 0x183   : > { %v4135_v44 = vpop.f32.mrf.mxu0  ;;  %v5039_v27 = vpop.f32.mrf.mxu1 }
 0x185   : > { %v745_v52 = vpop.f32.mrf.mxu0  ;;  %v5041_v56 = vpop.f32.mrf.mxu1 }
 0x187   : > { %v4150_v51 = vpop.f32.mrf.mxu0  ;;  %v5043_v11 = vpop.f32.mrf.mxu1 }
 0x188   : > { %v1011_v21 = vadd.f32 %v4150_v51, %v835_v22  ;;  %v2244_v51 = vor.u32 %v2243_v0, %v2240_v41 }
 0x189   : > { %v978_v23 = vpop.f32.mrf.mxu0  ;;  %v5045_v7 = vpop.f32.mrf.mxu1 }
 0x18a   : > { %v1009_v3 = vadd.f32 %v978_v23, %v827_v20  ;;  %v1132_v15 = vadd.f32 %v4160_v37, %v1011_v21  ;;  %v843_v23 = vadd.f32 %v5033_v35, %v742_v6  ;;  %v846_v37 = vadd.f32 %v5037_v33, %v745_v52 }
 0x18b   : > { %v4151_v55 = vpop.f32.mrf.mxu0  ;;  %v5047_v31 = vpop.f32.mrf.mxu1  ;;  %v5085_v36 = vrot.slane %v2244_v51, 4 }
 0x18c   : > { %v1012_v14 = vadd.f32 %v4151_v55, %v838_v62  ;;  %v1130_v61 = vadd.f32 %v1099_v46, %v1009_v3  ;;  %v854_v55 = vadd.f32 %v5035_v39, %v4135_v44 }
 0x18d   : > { %v981_v57 = vpop.f32.mrf.mxu0  ;;  %v4180_v13 = vpop.f32.mrf.mxu1 }
 0x18f   : > { %v4154_v28 = vpop.f32.mrf.mxu0  ;;  %v5049_v24 = vpop.f32.mrf.mxu1 }
 0x190   : > { %v1015_v47 = vadd.f32 %v4154_v28, %v851_v4 }
 0x191   : > { %v994_v29 = vpop.f32.mrf.mxu0  ;;  %v5051_v50 = vpop.f32.mrf.mxu1 }
 0x192   : > { %v1013_v46 = vadd.f32 %v994_v29, %v843_v23  ;;  %v1136_v39 = vadd.f32 %v5041_v56, %v1015_v47 }
 0x193   : > { %v4155_v60 = vpop.f32.mrf.mxu0  ;;  %v5053_v26 = vpop.f32.mrf.mxu1 }
 0x194   : > { %v1016_v17 = vadd.f32 %v4155_v60, %v854_v55  ;;  %v1134_v44 = vadd.f32 %v5043_v11, %v1013_v46  ;;  %v5139_v55 = vld [vmem:[%s5567_s3 + $0x18] sm:$0xf] }
 0x195   : > { %v997_v59 = vpop.f32.mrf.mxu0  ;;  %v5055_v42 = vpop.f32.mrf.mxu1 }
 0x196   : > { %5593 = vst [vmem:[#allocation7_spill] sm:$0xff] %v5055_v42  ;;  %v1014_v35 = vadd.f32 %v997_v59, %v846_v37  ;;  %v1137_v60 = vadd.f32 %v5045_v7, %v1016_v17  ;;  %v3335_v7 = vld [vmem:[#allocation2 + $0x48] sm:$0xf] }
 0x197   : > { %v4170_v40 = vpop.f32.mrf.mxu0  ;;  %v5057_v30 = vpop.f32.mrf.mxu1  ;;  %v3439_v51 = vshll.u32 %v3335_v7, 16 }
 0x198   : > { %5594 = vst [vmem:[#allocation8_spill] sm:$0xff] %v5057_v30  ;;  %v5075_v30 = vld [vmem:[#allocation2 + $0x4] sm:$0x1]  ;;  %v1135_v59 = vadd.f32 %v5047_v31, %v1014_v35 }
 0x199   : > { %v1328_v38 = vpop.f32.mrf.mxu0  ;;  %v5059_v2 = vpop.f32.mrf.mxu1  ;;  %v2247_v42 = vshll.u32 %v5075_v30, 16 }
 0x19a   : > { %5595 = vst [vmem:[#allocation9_spill] sm:$0xff] %v5059_v2  ;;  %v1359_v22 = vadd.f32 %v1328_v38, %v1130_v61  ;;  %v3436_v61 = vshrl.u32 %v3335_v7, 16 }
 0x19b   : > { %v4171_v63 = vpop.f32.mrf.mxu0  ;;  %v5061_v58 = vpop.f32.mrf.mxu1 }
 0x19c   : > { %5596 = vst [vmem:[#allocation10_spill] sm:$0xff] %v5061_v58  ;;  %v830_v58 = vadd.f32 %v829_v19, %v729_v45  ;;  %v1133_v19 = vadd.f32 %v4161_v16, %v1012_v14  ;;  %v5080_v45 = vrot.slane %v2247_v42, 5  ;;  %v1520_v42 = vadd.f32 %v5049_v24, %v1359_v22 }
 0x19d   : > { %v1331_v8 = vpop.f32.mrf.mxu0  ;;  %v5601_v62 = vld [vmem:[#allocation7_spill] sm:$0xff] }
 0x19e   : > { %v1010_v1 = vadd.f32 %v981_v57, %v830_v58  ;;  %v1362_v58 = vadd.f32 %v4171_v63, %v1133_v19  ;;  %v5098_v63 = vld [vmem:[#allocation2] sm:$0xe] }
 0x19f   : > { %v5602_v4 = vld [vmem:[#allocation8_spill] sm:$0xff] }
 0x1a0   : > { %v1131_v57 = vadd.f32 %v5039_v27, %v1010_v1  ;;  %v1523_v28 = vadd.f32 %v5051_v50, %v1362_v58  ;;  %v5103_v50 = vsel %vm2375_vm4, %v5020_v12, 0 }
 0x1a1   : > { %v5603_v47 = vld [vmem:[#allocation9_spill] sm:$0xff] }
 0x1a2   : > { %v1360_v6 = vadd.f32 %v1331_v8, %v1131_v57 }
 0x1a3   : > { %v4200_v49 = vpop.f32.mrf.mxu1  ;;  %v5604_v46 = vld [vmem:[#allocation10_spill] sm:$0xff] }
 0x1a4   : > { %v1521_v24 = vadd.f32 %v5053_v26, %v1360_v6 }
 0x1a5   : > { %v5073_v32 = vpop.f32.mrf.mxu1 }
 0x1a7   : > { %v4174_v5 = vpop.f32.mrf.mxu0  ;;  %v4201_v18 = vpop.f32.mrf.mxu1 }
 0x1a8   : > { %v1365_v29 = vadd.f32 %v4174_v5, %v1136_v39  ;;  %v5108_v5 = vld [vmem:[%s5567_s3 + $0x10] sm:$0xf]  ;;  %v5147_v39 = vld [vmem:[%s5567_s3 + $0x1c] sm:$0xf] }
 0x1a9   : > { %v5063_v48 = vpop.f32.mrf.mxu0  ;;  %v1843_v0 = vpop.f32.mrf.mxu1 }
 0x1aa   : > { %v1363_v11 = vadd.f32 %v5063_v48, %v1134_v44  ;;  %v5600_v48 = vld [vmem:[#allocation6_spill] sm:$0xff]  ;;  %v1526_v3 = vadd.f32 %v5601_v62, %v1365_v29 }
 0x1ab   : > { %v5067_v43 = vpop.f32.mrf.mxu0  ;;  %v5119_v12 = vsel %vm2375_vm4, %v5600_v48, 0 }
 0x1ac   : > { %v1366_v31 = vadd.f32 %v5067_v43, %v1137_v60  ;;  %v2570_v43 = vrot.slane %v5075_v30, 5 }
 0x1ad   : > { %v5071_v54 = vpop.f32.mrf.mxu0 }
 0x1ae   : > { %5598 = vst [vmem:[#allocation12_spill] sm:$0xff] %v5071_v54  ;;  %v1361_v54 = vadd.f32 %v4170_v40, %v1132_v15  ;;  %v4204_v27 = vpop.f32.mrf.mxu1  ;;  %v5127_v15 = vsel %vm2375_vm4, %v5108_v5, 0  ;;  %v1527_v57 = vadd.f32 %v5603_v47, %v1366_v31 }
 0x1af   : > { %v4190_v9 = vpop.f32.mrf.mxu0 }
 0x1b0   : > { %v1522_v41 = vadd.f32 %v4180_v13, %v1361_v54  ;;  %v2250_v13 = vsel %vm4567_vm12, %v5085_v36, %v5080_v45 }
 0x1b1   : > { %v1607_v2 = vpop.f32.mrf.mxu0 }
 0x1b2   : > { %v1640_v38 = vadd.f32 %v4190_v9, %v1522_v41  ;;  %v1638_v52 = vadd.f32 %v1607_v2, %v1520_v42  ;;  %v3935_v9 = vrot.slane %v5098_v63, 9 }
 0x1b3   : > { %v4191_v53 = vpop.f32.mrf.mxu0 }
 0x1b4   : > { %v1641_v8 = vadd.f32 %v4191_v53, %v1523_v28  ;;  %v1873_v2 = vadd.f32 %v4200_v49, %v1640_v38  ;;  %v5115_v53 = vld [vmem:[%s5566_s2] ss:$0 sm:$0xff]  ;;  %v1856_v49 = vpop.f32.mrf.mxu1  ;;  %v1871_v21 = vadd.f32 %v5073_v32, %v1638_v52  ;;  %v5134_v32 = vld [vmem:[%s5567_s3 + $0x14] sm:$0xf] }
 0x1b5   : > { %v1610_v25 = vpop.f32.mrf.mxu0  ;;  %v5599_v26 = vld [vmem:[#allocation12_spill] sm:$0xff]  ;;  %v5151_v28 = vsel %vm2375_vm4, %v5134_v32, 0 }
 0x1b6   : > { %v1364_v1 = vadd.f32 %v5599_v26, %v1135_v59  ;;  %v1639_v10 = vadd.f32 %v1610_v25, %v1521_v24  ;;  %v1524_v25 = vadd.f32 %v5602_v4, %v1363_v11  ;;  %v1874_v19 = vadd.f32 %v4201_v18, %v1641_v8  ;;  %v4205_v35 = vpop.f32.mrf.mxu1 }
 0x1b7   : > { %v4194_v40 = vpop.f32.mrf.mxu0  ;;  %v5164_v8 = vrot.slane %v3439_v51, 5 }
 0x1b8   : > { %v1644_v37 = vadd.f32 %v4194_v40, %v1526_v3  ;;  %v1525_v58 = vadd.f32 %v5604_v46, %v1364_v1  ;;  %v1872_v17 = vadd.f32 %v1843_v0, %v1639_v10  ;;  %v5155_v0 = vsel %vm2375_vm4, %v5139_v55, 0  ;;  %v2187_v46 = vld [vmem:[#allocation2 + $0x1c] sm:$0x1] }
 0x1b9   : > { %v1623_v16 = vpop.f32.mrf.mxu0 }
 0x1ba   : > { %v1642_v6 = vadd.f32 %v1623_v16, %v1524_v25  ;;  %v1877_v24 = vadd.f32 %v4204_v27, %v1644_v37 }
 0x1bb   : > { %v4195_v33 = vpop.f32.mrf.mxu0 }
 0x1bc   : > { %v1645_v44 = vadd.f32 %v4195_v33, %v1527_v57  ;;  %v5160_v33 = vsel %vm2375_vm4, %v5147_v39, 0  ;;  %v1875_v1 = vadd.f32 %v1856_v49, %v1642_v6  ;;  %v2184_v57 = vld [vmem:[#allocation2 + $0x18] sm:$0xf] }
 0x1bd   : > { %v1626_v56 = vpop.f32.mrf.mxu0 }
 0x1be   : > { %v1643_v52 = vadd.f32 %v1626_v56, %v1525_v58  ;;  %v5162_v56 = vrot.slane %v3436_v61, 4 }
 0x1bf   : > { %v4210_v54 = vpop.f32.mrf.mxu0 }
 0x1c0   : > { %v2030_v20 = vadd.f32 %v4210_v54, %v1873_v2  ;;  %v1859_v2 = vpop.f32.mrf.mxu1 }
 0x1c1   : > { %v1997_v14 = vpop.f32.mrf.mxu0  ;;  %v1876_v27 = vadd.f32 %v1859_v2, %v1643_v52  ;;  %v2175_v52 = vld [vmem:[#allocation2 + $0xc] sm:$0x1] }
 0x1c2   : > { %v2045_v23 = vadd.f32 %v5115_v53, %v2030_v20  ;;  %v2028_v22 = vadd.f32 %v1997_v14, %v1871_v21  ;;  %v1878_v20 = vadd.f32 %v4205_v35, %v1645_v44 }
 0x1c3   : > { %v4211_v41 = vpop.f32.mrf.mxu0 }
 0x1c4   : > { %v2053_v18 = vmax.f32 %v2045_v23, 0.0  ;;  %v2043_v38 = vadd.f32 %v5115_v53, %v2028_v22  ;;  %v2031_v42 = vadd.f32 %v4211_v41, %v1874_v19 }
 0x1c5   : > { %v2000_v40 = vpop.f32.mrf.mxu0 }
 0x1c6   : > { %v4030_v16 = vpack.c.bf16 %v2053_v18, %v2053_v18  ;;  %v2051_v29 = vmax.f32 %v2043_v38, 0.0  ;;  %v2046_v60 = vadd.f32 %v5115_v53, %v2031_v42  ;;  %v2029_v59 = vadd.f32 %v2000_v40, %v1872_v17 }
 0x1c7   : > { %v4214_v11 = vpop.f32.mrf.mxu0 }
 0x1c8   : > { %v2108_v7 = vshrl.u32 %v4030_v16, 16  ;;  %v4028_v31 = vpack.c.bf16 %v2051_v29, %v2051_v29  ;;  %v2054_v26 = vmax.f32 %v2046_v60, 0.0  ;;  %v2044_v10 = vadd.f32 %v5115_v53, %v2029_v59 }
 0x1c9   : > { %v2034_v54 = vadd.f32 %v4214_v11, %v1877_v24  ;;  %v2013_v48 = vpop.f32.mrf.mxu0  ;;  %v2111_v62 = vshll.u32 %v4030_v16, 16  ;;  %v5608_v24 = vld [vmem:[#allocation5_spill] sm:$0xff] }
 0x1ca   : > { %v2110_v21 = vrot.slane %v2108_v7, 7  ;;  %v2092_v3 = vshrl.u32 %v4028_v31, 16  ;;  %v4031_v14 = vpack.c.bf16 %v2054_v26, %v2054_v26  ;;  %v2095_v51 = vshll.u32 %v4028_v31, 16 }
 0x1cb   : > { %v2052_v4 = vmax.f32 %v2044_v10, 0.0  ;;  %v2049_v49 = vadd.f32 %v5115_v53, %v2034_v54  ;;  %v2032_v25 = vadd.f32 %v2013_v48, %v1875_v1  ;;  %v4215_v23 = vpop.f32.mrf.mxu0  ;;  %v5184_v48 = vld [vmem:[#allocation2 + $0x4c] sm:$0x1] }
 0x1cc   : > { %v2113_v22 = vor.u32 %v2111_v62, %v2110_v21  ;;  %v2114_v19 = vrot.slane %v2110_v21, 4  ;;  %v2094_v37 = vrot.slane %v2092_v3, 7  ;;  %v2116_v47 = vshrl.u32 %v4031_v14, 16  ;;  %v2190_v21 = vld [vmem:[#allocation2 + $0x20] sm:$0xf] }
 0x1cd   : > { %v2119_v58 = vshll.u32 %v4031_v14, 16  ;;  %v4029_v41 = vpack.c.bf16 %v2052_v4, %v2052_v4  ;;  %v2057_v17 = vmax.f32 %v2049_v49, 0.0  ;;  %v2047_v35 = vadd.f32 %v5115_v53, %v2032_v25  ;;  %v2016_v59 = vpop.f32.mrf.mxu0  ;;  %v2193_v62 = vld [vmem:[#allocation2 + $0x24] sm:$0x1] }
 0x1ce   : > { %v2185_v6 = vsel %vm5169_vm6, %v2113_v22, %v2184_v57  ;;  %v2188_v38 = vsel %vm4426_vm2, %v2114_v19, %v2187_v46  ;;  %v2097_v42 = vor.u32 %v2095_v51, %v2094_v37  ;;  %v2098_v44 = vrot.slane %v2094_v37, 4  ;;  %v2178_v22 = vld [vmem:[#allocation2 + $0x10] sm:$0xf]  ;;  %v2181_v19 = vld [vmem:[#allocation2 + $0x14] sm:$0x1] }
 0x1cf   : > { %2189 = vst [vmem:[#allocation2 + $0x1c] sm:$0x1] %v2188_v38  ;;  %2186 = vst [vmem:[#allocation2 + $0x18] sm:$0xf] %v2185_v6  ;;  %v2118_v40 = vrot.slane %v2116_v47, 7  ;;  %v2100_v16 = vshrl.u32 %v4029_v41, 16  ;;  %v4034_v60 = vpack.c.bf16 %v2057_v17, %v2057_v17  ;;  %v2035_v31 = vadd.f32 %v4215_v23, %v1878_v20 }
 0x1d0   : > { %v2103_v29 = vshll.u32 %v4029_v41, 16  ;;  %v2173_v11 = vsel %vm5169_vm6, %v2097_v42, %v5608_v24  ;;  %v2176_v2 = vsel %vm4426_vm2, %v2098_v44, %v2175_v52  ;;  %v2055_v7 = vmax.f32 %v2047_v35, 0.0  ;;  %v2208_v41 = vld [vmem:[#allocation2 + $0x38] sm:$0xf]  ;;  %v2211_v17 = vld [vmem:[#allocation2 + $0x3c] sm:$0x1] }
 0x1d1   : > { %2174 = vst [vmem:[#allocation2 + $0x8] sm:$0xf] %v2173_v11  ;;  %2177 = vst [vmem:[#allocation2 + $0xc] sm:$0x1] %v2176_v2  ;;  %v2121_v26 = vor.u32 %v2119_v58, %v2118_v40  ;;  %v2122_v1 = vrot.slane %v2118_v40, 4  ;;  %v2102_v10 = vrot.slane %v2100_v16, 7  ;;  %v2050_v14 = vadd.f32 %v5115_v53, %v2035_v31 }
 0x1d2   : > { %v2140_v54 = vshrl.u32 %v4034_v60, 16  ;;  %v4032_v3 = vpack.c.bf16 %v2055_v7, %v2055_v7  ;;  %v2033_v51 = vadd.f32 %v2016_v59, %v1876_v27  ;;  %v3445_v4 = vshll.u32 %v5184_v48, 16 }
 0x1d3   : > { %v2191_v20 = vsel %vm5169_vm6, %v2121_v26, %v2190_v21  ;;  %v2194_v49 = vsel %vm4426_vm2, %v2122_v1, %v2193_v62  ;;  %v2105_v25 = vor.u32 %v2103_v29, %v2102_v10  ;;  %v2106_v23 = vrot.slane %v2102_v10, 4  ;;  %v2196_v29 = vld [vmem:[#allocation2 + $0x28] sm:$0xf]  ;;  %v2199_v26 = vld [vmem:[#allocation2 + $0x2c] sm:$0x1] }
 0x1d4   : > { %2195 = vst [vmem:[#allocation2 + $0x24] sm:$0x1] %v2194_v49  ;;  %2192 = vst [vmem:[#allocation2 + $0x20] sm:$0xf] %v2191_v20  ;;  %v2142_v37 = vrot.slane %v2140_v54, 7  ;;  %v2143_v47 = vshll.u32 %v4034_v60, 16  ;;  %v2048_v6 = vadd.f32 %v5115_v53, %v2033_v51 }
 0x1d5   : > { %v2124_v57 = vshrl.u32 %v4032_v3, 16  ;;  %v2058_v46 = vmax.f32 %v2050_v14, 0.0  ;;  %v2179_v27 = vsel %vm5169_vm6, %v2105_v25, %v2178_v22  ;;  %v2182_v58 = vsel %vm4426_vm2, %v2106_v23, %v2181_v19  ;;  %v5609_v20 = vld [vmem:[#allocation11_spill] sm:$0xff] }
 0x1d6   : > { %v2127_v35 = vshll.u32 %v4032_v3, 16  ;;  %2183 = vst [vmem:[#allocation2 + $0x14] sm:$0x1] %v2182_v58  ;;  %2180 = vst [vmem:[#allocation2 + $0x10] sm:$0xf] %v2179_v27  ;;  %v2145_v38 = vor.u32 %v2143_v47, %v2142_v37  ;;  %v2146_v42 = vrot.slane %v2142_v37, 4 }
 0x1d7   : > { %v2126_v44 = vrot.slane %v2124_v57, 7  ;;  %v4035_v52 = vpack.c.bf16 %v2058_v46, %v2058_v46  ;;  %v2223_v40 = vld [vmem:[#allocation2 + $0x18] sm:$0xf]  ;;  %v5197_v16 = vld [vmem:[#allocation2 + $0x1c] sm:$0x1]  ;;  %v2056_v60 = vmax.f32 %v2048_v6, 0.0 }
 0x1d8   : > { %v2280_v59 = vshrl.u32 %v2223_v40, 16  ;;  %v2283_v24 = vshll.u32 %v2223_v40, 16  ;;  %v2289_v11 = vshll.u32 %v5197_v16, 16  ;;  %v2209_v2 = vsel %vm5169_vm6, %v2145_v38, %v2208_v41  ;;  %v2221_v1 = vld [vmem:[#allocation2 + $0x8] sm:$0xf] }
 0x1d9   : > { %v2212_v53 = vsel %vm4426_vm2, %v2146_v42, %v2211_v17  ;;  %v2129_v7 = vor.u32 %v2127_v35, %v2126_v44  ;;  %v2130_v31 = vrot.slane %v2126_v44, 4  ;;  %2210 = vst [vmem:[#allocation2 + $0x38] sm:$0xf] %v2209_v2  ;;  %v2148_v10 = vshrl.u32 %v4035_v52, 16  ;;  %v2214_v47 = vld [vmem:[#allocation2 + $0x40] sm:$0xf] }
 0x1da   : > { %2213 = vst [vmem:[#allocation2 + $0x3c] sm:$0x1] %v2212_v53  ;;  %v2151_v54 = vshll.u32 %v4035_v52, 16  ;;  %v4033_v21 = vpack.c.bf16 %v2056_v60, %v2056_v60  ;;  %v2252_v62 = vshrl.u32 %v2221_v1, 16  ;;  %v2255_v51 = vshll.u32 %v2221_v1, 16 }
 0x1db   : > { %v2197_v3 = vsel %vm5169_vm6, %v2129_v7, %v2196_v29  ;;  %v2200_v14 = vsel %vm4426_vm2, %v2130_v31, %v2199_v26  ;;  %v3927_v49 = vcombine.low %v5609_v20, %v2221_v1  ;;  %v2150_v25 = vrot.slane %v2148_v10, 7  ;;  %v2224_v37 = vld [vmem:[#allocation2 + $0x20] sm:$0xf]  ;;  %v2217_v57 = vld [vmem:[#allocation2 + $0x44] sm:$0x1] }
 0x1dc   : > { %2201 = vst [vmem:[#allocation2 + $0x2c] sm:$0x1] %v2200_v14  ;;  %2198 = vst [vmem:[#allocation2 + $0x28] sm:$0xf] %v2197_v3  ;;  %v2132_v23 = vshrl.u32 %v4033_v21, 16  ;;  %v2135_v22 = vshll.u32 %v4033_v21, 16 }
 0x1dd   : > { %v2254_v19 = vrot.slane %v2252_v62, 4  ;;  %v2257_v46 = vrot.slane %v2255_v51, 5  ;;  %4228 = vmatprep.mubr.msk.bf16.mxu0 %vm2362_vm3, %v3927_v49  ;;  %v2282_v27 = vrot.slane %v2280_v59, 4  ;;  %v2285_v58 = vrot.slane %v2283_v24, 5  ;;  %v2222_v38 = vld [vmem:[#allocation2 + $0x10] sm:$0xf] }
 0x1de   : > { %v2294_v41 = vshrl.u32 %v2224_v37, 16  ;;  %v2153_v17 = vor.u32 %v2151_v54, %v2150_v25  ;;  %v2154_v35 = vrot.slane %v2150_v25, 4  ;;  %v2134_v6 = vrot.slane %v2132_v23, 7  ;;  %v2202_v44 = vld [vmem:[#allocation2 + $0x30] sm:$0xf] }
 0x1df   : > { %v2297_v42 = vshll.u32 %v2224_v37, 16  ;;  %v2205_v52 = vld [vmem:[#allocation2 + $0x34] sm:$0x1]  ;;  %v2266_v29 = vshrl.u32 %v2222_v38, 16  ;;  %v2269_v60 = vshll.u32 %v2222_v38, 16  ;;  %v3928_v2 = vcombine.low %v2222_v38, %v2223_v40 }
 0x1e0   : > { %v2296_v53 = vrot.slane %v2294_v41, 4  ;;  %v5210_v7 = vld [vmem:[#allocation2 + $0xc] sm:$0x1]  ;;  %v2215_v31 = vsel %vm5169_vm6, %v2153_v17, %v2214_v47  ;;  %v2218_v59 = vsel %vm4426_vm2, %v2154_v35, %v2217_v57  ;;  %v2137_v24 = vor.u32 %v2135_v22, %v2134_v6  ;;  %v5216_v1 = vld [vmem:[#allocation2 + $0x14] sm:$0x1] }
 0x1e1   : > { %v2138_v26 = vrot.slane %v2134_v6, 4  ;;  %2219 = vst [vmem:[#allocation2 + $0x44] sm:$0x1] %v2218_v59  ;;  %2216 = vst [vmem:[#allocation2 + $0x40] sm:$0xf] %v2215_v31  ;;  %v2268_v10 = vrot.slane %v2266_v29, 4  ;;  %4229 = vmatmul.mubr.msk.bf16.vlgmr.msra.gmra.mxu0 %vm2362_vm3, %v3928_v2  ;;  %v2258_v21 = vor.u32 %v2257_v46, %v2254_v19 }
 0x1e2   : > { %v2271_v54 = vrot.slane %v2269_v60, 5  ;;  %v2299_v40 = vrot.slane %v2297_v42, 5  ;;  %v5219_v62 = vld [vmem:[#allocation2 + $0x38] sm:$0xf]  ;;  %v2203_v3 = vsel %vm5169_vm6, %v2137_v24, %v2202_v44  ;;  %v2261_v51 = vshll.u32 %v5210_v7, 16  ;;  %4247 = vmatpush3.bf16.msra.mxu0 %v5119_v12 }
 0x1e3   : > { %v2206_v14 = vsel %vm4426_vm2, %v2138_v26, %v2205_v52  ;;  %v2336_v20 = vshrl.u32 %v5219_v62, 16  ;;  %2204 = vst [vmem:[#allocation2 + $0x30] sm:$0xf] %v2203_v3  ;;  %v2225_v49 = vld [vmem:[#allocation2 + $0x28] sm:$0xf]  ;;  %v2259_v25 = vrot.slane %v2258_v21, 4  ;;  %4320 = vmatprep.subr.msk.bf16.mxu0 %vm2375_vm4, %v5134_v32  ;;  %v2286_v32 = vor.u32 %v2285_v58, %v2282_v27 }
 0x1e4   : > { %2207 = vst [vmem:[#allocation2 + $0x34] sm:$0x1] %v2206_v14  ;;  %v2339_v23 = vshll.u32 %v5219_v62, 16  ;;  %v2272_v22 = vor.u32 %v2271_v54, %v2268_v10  ;;  %v2275_v19 = vshll.u32 %v5216_v1, 16  ;;  %v5230_v61 = vld [vmem:[#allocation2 + $0x24] sm:$0x1]  ;;  %v3929_v57 = vcombine.low %v2224_v37, %v2225_v49 }
 0x1e5   : > { %v2308_v18 = vshrl.u32 %v2225_v49, 16  ;;  %v2311_v47 = vshll.u32 %v2225_v49, 16  ;;  %v2263_v46 = vrot.slane %v2261_v51, 5  ;;  %v5234_v41 = vld [vmem:[#allocation2 + $0x2c] sm:$0x1]  ;;  %v2338_v12 = vrot.slane %v2336_v20, 4 }
 0x1e6   : > { %v2341_v17 = vrot.slane %v2339_v23, 5  ;;  %v2273_v35 = vrot.slane %v2272_v22, 4  ;;  %v2277_v6 = vrot.slane %v2275_v19, 5  ;;  %v5236_v38 = vld [vmem:[#allocation2 + $0x3c] sm:$0x1]  ;;  %4232 = vmatprep.mubr.msk.bf16.mxu0 %vm2362_vm3, %v3929_v57  ;;  %v2291_v60 = vrot.slane %v2289_v11, 5 }
 0x1e7   : > { %v2310_v42 = vrot.slane %v2308_v18, 4  ;;  %v2313_v44 = vrot.slane %v2311_v47, 5  ;;  %v2264_v52 = vsel %vm4567_vm12, %v2259_v25, %v2263_v46  ;;  %v2300_v2 = vor.u32 %v2299_v40, %v2296_v53  ;;  %v2545_v36 = vld [vmem:[#allocation2 + $0x8] sm:$0xe]  ;;  %v2546_v53 = vld [vmem:[#allocation2 + $0x10] sm:$0xe] }
 0x1e8   : > { %v3919_v37 = vcombine.low %v2250_v13, %v2264_v52  ;;  %v2278_v29 = vsel %vm4567_vm12, %v2273_v35, %v2277_v6  ;;  %v2287_v31 = vrot.slane %v2286_v32, 4  ;;  %v2303_v59 = vshll.u32 %v5230_v61, 16  ;;  %v2547_v14 = vld [vmem:[#allocation2 + $0x18] sm:$0xe]  ;;  %v4369_v63 = vld [vmem:[#allocation2 + $0x8] ss:$8 sps:$4 sm:$0xff]  }
 0x1e9   : > { %v2314_v24 = vor.u32 %v2313_v44, %v2310_v42  ;;  %v2317_v26 = vshll.u32 %v5234_v41, 16  ;;  %v2301_v27 = vrot.slane %v2300_v2, 4  ;;  %v2342_v58 = vor.u32 %v2341_v17, %v2338_v12  ;;  %v5272_v19 = vld [vmem:[#allocation2 + $0xc] sm:$0x1]  ;;  %v3047_v46 = vld [vmem:[#allocation2 + $0x8] sm:$0xe] }
 0x1ea   : > { %4218 = vmatprep.mubr.msk.bf16.mxu1 %vm2362_vm3, %v3919_v37  ;;  %v2345_v45 = vshll.u32 %v5236_v38, 16  ;;  %v5260_v11 = vsel %vm4563_vm11, %v3935_v9, %v2570_v43  ;;  %v2226_v10 = vld [vmem:[#allocation2 + $0x30] sm:$0xf]  ;;  %v2292_v54 = vsel %vm4567_vm12, %v2287_v31, %v2291_v60  ;;  %v2305_v40 = vrot.slane %v2303_v59, 5  ;;  %v5284_v37 = vld [vmem:[#allocation2 + $0x14] sm:$0x1] }
 0x1eb   : > { %v2315_v21 = vrot.slane %v2314_v24, 4  ;;  %v2319_v3 = vrot.slane %v2317_v26, 5  ;;  %v2322_v51 = vshrl.u32 %v2226_v10, 16  ;;  %v2325_v20 = vshll.u32 %v2226_v10, 16  ;;  %v5265_v25 = vld [vmem:[#allocation2 + $0x34] sm:$0x1] }
 0x1ec   : > { %v3930_v49 = vcombine.low %v2226_v10, %v5219_v62  ;;  %v3920_v30 = vcombine.low %v2278_v29, %v2292_v54  ;;  %v2306_v9 = vsel %vm4567_vm12, %v2301_v27, %v2305_v40  ;;  %v2331_v23 = vshll.u32 %v5265_v25, 16  ;;  %v3048_v42 = vld [vmem:[#allocation2 + $0x10] sm:$0xe]  ;;  %v2549_v31 = vld [vmem:[#allocation2 + $0x28] sm:$0xe] }
 0x1ed   : > { %v2320_v43 = vsel %vm4567_vm12, %v2315_v21, %v2319_v3  ;;  %v2343_v22 = vrot.slane %v2342_v58, 4  ;;  %v2324_v18 = vrot.slane %v2322_v51, 4  ;;  %v2327_v47 = vrot.slane %v2325_v20, 5  ;;  %v4370_v59 = vld [vmem:[#allocation2 + $0x18] ss:$8 sps:$4 sm:$0xff]  }
 0x1ee   : > { %4233 = vmatmul.mubr.msk.bf16.gmra.mxu0 %vm2362_vm3, %v3930_v49  ;;  %4219 = vmatmul.mubr.msk.bf16.vlgmr.msra.gmra.mxu1 %vm2362_vm3, %v3920_v30  ;;  %v3921_v62 = vcombine.low %v2306_v9, %v2320_v43  ;;  %v3936_v57 = vrot.slane %v2545_v36, 9  ;;  %v2347_v12 = vrot.slane %v2345_v45, 5  ;;  %v2574_v17 = vrot.slane %v5210_v7, 5  ;;  %v5297_v27 = vld [vmem:[#allocation2 + $0x1c] sm:$0x1] }
 0x1ef   : > { %4237 = vmatpush3.bf16.msra.mxu1 %v5103_v50  ;;  %4248 = vmatprep.mubr.msk.bf16.mxu0 %vm2362_vm3, %v4369_v63  ;;  %v3937_v35 = vrot.slane %v2546_v53, 9  ;;  %v2578_v6 = vrot.slane %v5216_v1, 5  ;;  %v2328_v44 = vor.u32 %v2327_v47, %v2324_v18  ;;  %v3938_v52 = vrot.slane %v2547_v14, 9  ;;  %v2548_v50 = vld [vmem:[#allocation2 + $0x20] sm:$0xe] }
 0x1f0   : > { %4222 = vmatprep.mubr.msk.bf16.mxu1 %vm2362_vm3, %v3921_v62  ;;  %4319 = vmatprep.subr.msk.bf16.mxu1 %vm2375_vm4, %v5108_v5  ;;  %v2582_v32 = vrot.slane %v5197_v16, 5  ;;  %v3442_v29 = vor.u32 %v5164_v8, %v5162_v56  ;;  %v2333_v7 = vrot.slane %v2331_v23, 5  ;;  %v2348_v1 = vsel %vm4567_vm12, %v2343_v22, %v2347_v12  ;;  %v3049_v58 = vld [vmem:[#allocation2 + $0x18] sm:$0xe]  ;;  %v4371_v45 = vld [vmem:[#allocation2 + $0x28] ss:$8 sps:$4 sm:$0xff]  }
 0x1f1   : > { %v3967_v60 = vrot.slane %v3047_v46, 9  ;;  %v3073_v2 = vrot.slane %v5272_v19, 5  ;;  %v2329_v24 = vrot.slane %v2328_v44, 4  ;;  %v2575_v5 = vsel %vm4563_vm11, %v3936_v57, %v2574_v17  ;;  %v5308_v40 = vld [vmem:[#allocation2 + $0x24] sm:$0x1] }
 0x1f2   : > { %v5295_v16 = vsel %vm4563_vm11, %v3937_v35, %v2578_v6  ;;  %v3968_v26 = vrot.slane %v3048_v42, 9  ;;  %v5301_v36 = vsel %vm4563_vm11, %v3938_v52, %v2582_v32  ;;  %v3077_v10 = vrot.slane %v5284_v37, 5  ;;  %v3050_v21 = vld [vmem:[#allocation2 + $0x20] sm:$0xe]  ;;  %v2550_v49 = vld [vmem:[#allocation2 + $0x30] sm:$0xe] }
 0x1f3   : > { %v5305_v53 = vsel %vm4563_vm11, %v3967_v60, %v3073_v2  ;;  %v3939_v54 = vrot.slane %v2548_v50, 9  ;;  %v2334_v3 = vsel %vm4567_vm12, %v2329_v24, %v2333_v7  ;;  %v2586_v14 = vrot.slane %v5230_v61, 5  ;;  %v2551_v23 = vld [vmem:[#allocation2 + $0x38] sm:$0xe]  ;;  %v5317_v22 = vld [vmem:[#allocation2 + $0x34] sm:$0x1] }
 0x1f4   : > { %v3940_v51 = vrot.slane %v2549_v31, 9  ;;  %v2590_v20 = vrot.slane %v5234_v41, 5  ;;  %v3922_v30 = vcombine.low %v2334_v3, %v2348_v1  ;;  %v3078_v63 = vsel %vm4563_vm11, %v3968_v26, %v3077_v10  ;;  %v3051_v62 = vld [vmem:[#allocation2 + $0x28] sm:$0xe]  ;;  %v3052_v57 = vld [vmem:[#allocation2 + $0x30] sm:$0xe] }
 0x1f5   : > { %v3969_v9 = vrot.slane %v3049_v58, 9  ;;  %v3081_v43 = vrot.slane %v5297_v27, 5  ;;  %v3943_v18 = vcombine.low %v5260_v11, %v2575_v5  ;;  %v3944_v61 = vcombine.low %v5295_v16, %v5301_v36  ;;  %v5331_v35 = vld [vmem:[#allocation2 + $0x2c] sm:$0x1]  ;;  %v2818_v6 = vld [vmem:[#allocation2 + $0x8] sm:$0xf] }
 0x1f6   : > { %4249 = vmatmul.mubr.msk.bf16.vlgmr.msra.gmra.mxu0 %vm2362_vm3, %v4370_v59  ;;  %v3975_v41 = vcombine.low %v5305_v53, %v3078_v63  ;;  %v3970_v47 = vrot.slane %v3050_v21, 9  ;;  %4223 = vmatmul.mubr.msk.bf16.gmra.mxu1 %vm2362_vm3, %v3922_v30  ;;  %v2587_v46 = vsel %vm4563_vm11, %v3939_v54, %v2586_v14  ;;  %v2591_v12 = vsel %vm4563_vm11, %v3940_v51, %v2590_v20  ;;  %v2820_v2 = vld [vmem:[#allocation2 + $0x10] sm:$0xf]  ;;  %v3053_v24 = vld [vmem:[#allocation2 + $0x38] sm:$0xe] }
 0x1f7   : > { %4252 = vmatprep.mubr.msk.bf16.mxu0 %vm2362_vm3, %v4371_v45  ;;  %v3085_v11 = vrot.slane %v5308_v40, 5  ;;  %v3941_v17 = vrot.slane %v2550_v49, 9  ;;  %4238 = vmatprep.mubr.msk.bf16.mxu1 %vm2362_vm3, %v3943_v18  ;;  %v5337_v42 = vsel %vm4563_vm11, %v3969_v9, %v3081_v43  ;;  %v2594_v44 = vrot.slane %v5265_v25, 5  ;;  %v5361_v58 = vld [vmem:[#allocation2 + $0x3c] sm:$0x1] }
 0x1f8   : > { %4267 = vmatpush3.bf16.msra.mxu0 %v5151_v28  ;;  %v3942_v52 = vrot.slane %v2551_v23, 9  ;;  %v2598_v32 = vrot.slane %v5236_v38, 5  ;;  %v3971_v7 = vrot.slane %v3051_v62, 9  ;;  %v3972_v1 = vrot.slane %v3052_v57, 9  ;;  %v4372_v28 = vld [vmem:[#allocation2 + $0x38] ss:$8 sps:$4 sm:$0xff]  }
 0x1f9   : > { %v5343_v50 = vsel %vm4563_vm11, %v3970_v47, %v3085_v11  ;;  %v3093_v60 = vrot.slane %v5317_v22, 5  ;;  %4322 = vmatprep.subr.msk.bf16.mxu0 %vm2375_vm4, %v5147_v39  ;;  %v5350_v31 = vsel %vm4563_vm11, %v3941_v17, %v2594_v44  ;;  %v3089_v25 = vrot.slane %v5331_v35, 5  ;;  %v3054_v45 = vld [vmem:[#allocation2 + $0x40] sm:$0xe]  ;;  %v5366_v21 = vld [vmem:[#allocation2 + $0x44] sm:$0x1] }
 0x1fa   : > { %v5354_v38 = vsel %vm4563_vm11, %v3942_v52, %v2598_v32  ;;  %v2835_v59 = vshrl.u32 %v2818_v6, 16  ;;  %v3945_v5 = vcombine.low %v2587_v46, %v2591_v12  ;;  %v3976_v16 = vcombine.low %v5337_v42, %v5343_v50  ;;  %v2822_v49 = vld [vmem:[#allocation2 + $0x18] sm:$0xf]  ;;  %v2824_v23 = vld [vmem:[#allocation2 + $0x20] sm:$0xf] }
 0x1fb   : > { %v3946_v39 = vcombine.low %v5350_v31, %v5354_v38  ;;  %v2838_v26 = vshll.u32 %v2818_v6, 16  ;;  %v3094_v36 = vsel %vm4563_vm11, %v3972_v1, %v3093_v60  ;;  %v2844_v10 = vshll.u32 %v5272_v19, 16  ;;  %v3321_v6 = vld [vmem:[#allocation2 + $0x10] sm:$0xf]  ;;  %v5384_v42 = vld [vmem:[#allocation2 + $0x14] sm:$0x1] }
 0x1fc   : > { %v2837_v53 = vrot.slane %v2835_v59, 4  ;;  %v2849_v54 = vshrl.u32 %v2820_v2, 16  ;;  %v2852_v14 = vshll.u32 %v2820_v2, 16  ;;  %v2858_v51 = vshll.u32 %v5284_v37, 16  ;;  %v3323_v50 = vld [vmem:[#allocation2 + $0x18] sm:$0xf] }
 0x1fd   : > { %v2840_v3 = vrot.slane %v2838_v26, 5  ;;  %v3973_v20 = vrot.slane %v3053_v24, 9  ;;  %v3090_v30 = vsel %vm4563_vm11, %v3971_v7, %v3089_v25  ;;  %v3097_v9 = vrot.slane %v5361_v58, 5  ;;  %v5394_v25 = vld [vmem:[#allocation2 + $0x1c] sm:$0x1] }
 0x1fe   : > { %4253 = vmatmul.mubr.msk.bf16.gmra.mxu0 %vm2362_vm3, %v4372_v28  ;;  %v2851_v63 = vrot.slane %v2849_v54, 4  ;;  %v3974_v43 = vrot.slane %v3054_v45, 9  ;;  %4239 = vmatmul.mubr.msk.bf16.vlgmr.msra.gmra.mxu1 %vm2362_vm3, %v3944_v61  ;;  %v3977_v19 = vcombine.low %v3090_v30, %v3094_v36  ;;  %v2854_v47 = vrot.slane %v2852_v14, 5  ;;  %v2826_v36 = vld [vmem:[#allocation2 + $0x28] sm:$0xf] }
 0x1ff   : > { %4268 = vmatprep.mubr.msk.bf16.mxu0 %vm2362_vm3, %v3975_v41  ;;  %v2841_v18 = vor.u32 %v2840_v3, %v2837_v53  ;;  %v3101_v37 = vrot.slane %v5366_v21, 5  ;;  %4257 = vmatpush3.bf16.msra.mxu1 %v5127_v15  ;;  %v2846_v62 = vrot.slane %v2844_v10, 5  ;;  %v2860_v57 = vrot.slane %v2858_v51, 5 }
 0x200   : > { %4242 = vmatprep.mubr.msk.bf16.mxu1 %vm2362_vm3, %v3945_v5  ;;  %v2863_v46 = vshrl.u32 %v2822_v49, 16  ;;  %v2866_v12 = vshll.u32 %v2822_v49, 16  ;;  %v2855_v17 = vor.u32 %v2854_v47, %v2851_v63  ;;  %v5380_v61 = vsel %vm4563_vm11, %v3973_v20, %v3097_v9  ;;  %4321 = vmatprep.subr.msk.bf16.mxu1 %vm2375_vm4, %v5139_v55  ;;  %v2828_v49 = vld [vmem:[#allocation2 + $0x30] sm:$0xf] }
 0x201   : > { %v2842_v11 = vrot.slane %v2841_v18, 4  ;;  %v2877_v41 = vshrl.u32 %v2824_v23, 16  ;;  %v5388_v15 = vsel %vm4563_vm11, %v3974_v43, %v3101_v37  ;;  %v2872_v32 = vshll.u32 %v5297_v27, 16 }
 0x202   : > { %v2865_v44 = vrot.slane %v2863_v46, 4  ;;  %v2868_v52 = vrot.slane %v2866_v12, 5  ;;  %v2856_v1 = vrot.slane %v2855_v17, 4  ;;  %v2880_v2 = vshll.u32 %v2824_v23, 16  ;;  %v3325_v23 = vld [vmem:[#allocation2 + $0x20] sm:$0xf] }
 0x203   : > { %v2847_v7 = vsel %vm4567_vm12, %v2842_v11, %v2846_v62  ;;  %v2879_v60 = vrot.slane %v2877_v41, 4  ;;  %v2886_v28 = vshll.u32 %v5308_v40, 16  ;;  %v3338_v59 = vshrl.u32 %v3321_v6, 16  ;;  %v5412_v62 = vld [vmem:[#allocation2 + $0x24] sm:$0x1] }
 0x204   : > { %v2869_v55 = vor.u32 %v2868_v52, %v2865_v44  ;;  %v3341_v24 = vshll.u32 %v3321_v6, 16  ;;  %v2861_v5 = vsel %vm4567_vm12, %v2856_v1, %v2860_v57  ;;  %v2882_v26 = vrot.slane %v2880_v2, 5  ;;  %v3327_v6 = vld [vmem:[#allocation2 + $0x28] sm:$0xf]  ;;  %v2830_v1 = vld [vmem:[#allocation2 + $0x38] sm:$0xf] }
 0x205   : > { %v3347_v27 = vshll.u32 %v5384_v42, 16  ;;  %v3352_v45 = vshrl.u32 %v3323_v50, 16  ;;  %v3959_v53 = vcombine.low %v2847_v7, %v2861_v5  ;;  %v3978_v10 = vcombine.low %v5380_v61, %v5388_v15  ;;  %v5420_v15 = vld [vmem:[%s5567_s3 + $0x20] sm:$0xf] }
 0x206   : > { %4269 = vmatmul.mubr.msk.bf16.vlgmr.msra.gmra.mxu0 %vm2362_vm3, %v3976_v16  ;;  %v2870_v54 = vrot.slane %v2869_v55, 4  ;;  %v3340_v40 = vrot.slane %v3338_v59, 4  ;;  %4243 = vmatmul.mubr.msk.bf16.gmra.mxu1 %vm2362_vm3, %v3946_v39  ;;  %v2874_v3 = vrot.slane %v2872_v32, 5  ;;  %v2883_v14 = vor.u32 %v2882_v26, %v2879_v60 }
 0x207   : > { %4272 = vmatprep.mubr.msk.bf16.mxu0 %vm2362_vm3, %v3977_v19  ;;  %v2888_v51 = vrot.slane %v2886_v28, 5  ;;  %v3343_v20 = vrot.slane %v3341_v24, 5  ;;  %4258 = vmatprep.mubr.msk.bf16.mxu1 %vm2362_vm3, %v3959_v53  ;;  %v3354_v16 = vrot.slane %v3352_v45, 4  ;;  %v3355_v30 = vshll.u32 %v3323_v50, 16  ;;  %v5423_v50 = vld [vmem:[#allocation2 + $0x2c] sm:$0x1] }
 0x208   : > { %v3361_v63 = vshll.u32 %v5394_v25, 16  ;;  %v2891_v9 = vshrl.u32 %v2826_v36, 16  ;;  %4287 = vmatpush3.bf16.msra.mxu0 %v5160_v33  ;;  %v2884_v43 = vrot.slane %v2883_v14, 4  ;;  %v3349_v38 = vrot.slane %v3347_v27, 5 }
 0x209   : > { %v3344_v31 = vor.u32 %v3343_v20, %v3340_v40  ;;  %v2894_v39 = vshll.u32 %v2826_v36, 16  ;;  %v2875_v19 = vsel %vm4567_vm12, %v2870_v54, %v2874_v3  ;;  %v3357_v18 = vrot.slane %v3355_v30, 5 }
 0x20a   : > { %v2893_v47 = vrot.slane %v2891_v9, 4  ;;  %v2905_v37 = vshrl.u32 %v2828_v49, 16  ;;  %v2889_v57 = vsel %vm4567_vm12, %v2884_v43, %v2888_v51  ;;  %v2900_v33 = vshll.u32 %v5331_v35, 16 }
 0x20b   : > { %v3345_v46 = vrot.slane %v3344_v31, 4  ;;  %v2896_v12 = vrot.slane %v2894_v39, 5  ;;  %v3358_v11 = vor.u32 %v3357_v18, %v3354_v16  ;;  %v3363_v17 = vrot.slane %v3361_v63, 5 }
 0x20c   : > { %v2907_v61 = vrot.slane %v2905_v37, 4  ;;  %v2908_v41 = vshll.u32 %v2828_v49, 16  ;;  %v3960_v44 = vcombine.low %v2875_v19, %v2889_v57  ;;  %v2914_v32 = vshll.u32 %v5317_v22, 16  ;;  %v2832_v22 = vld [vmem:[#allocation2 + $0x40] sm:$0xf] }
 0x20d   : > { %v2897_v52 = vor.u32 %v2896_v12, %v2893_v47  ;;  %v3366_v7 = vshrl.u32 %v3325_v23, 16  ;;  %v3350_v35 = vsel %vm4567_vm12, %v3345_v46, %v3349_v38  ;;  %v3359_v60 = vrot.slane %v3358_v11, 4  ;;  %v3329_v38 = vld [vmem:[#allocation2 + $0x30] sm:$0xf]  ;;  %v3331_v47 = vld [vmem:[#allocation2 + $0x38] sm:$0xf] }
 0x20e   : > { %4273 = vmatmul.mubr.msk.bf16.gmra.mxu0 %vm2362_vm3, %v3978_v10  ;;  %v2910_v2 = vrot.slane %v2908_v41, 5  ;;  %v3369_v55 = vshll.u32 %v3325_v23, 16  ;;  %4259 = vmatmul.mubr.msk.bf16.vlgmr.msra.gmra.mxu1 %vm2362_vm3, %v3960_v44  ;;  %v2902_v28 = vrot.slane %v2900_v33, 5  ;;  %v3375_v24 = vshll.u32 %v5412_v62, 16  ;;  %v5451_v41 = vld [vmem:[#allocation2 + $0x34] sm:$0x1] }
 0x20f   : > { %v3368_v59 = vrot.slane %v3366_v7, 4  ;;  %v3380_v5 = vshrl.u32 %v3327_v6, 16  ;;  %4277 = vmatpush3.bf16.msra.mxu1 %v5155_v0  ;;  %v3364_v26 = vsel %vm4567_vm12, %v3359_v60, %v3363_v17  ;;  %v2898_v27 = vrot.slane %v2897_v52, 4  ;;  %v3333_v7 = vld [vmem:[#allocation2 + $0x40] sm:$0xf] }
 0x210   : > { %v2911_v45 = vor.u32 %v2910_v2, %v2907_v61  ;;  %v3371_v36 = vrot.slane %v3369_v55, 5  ;;  %v3991_v53 = vcombine.low %v3350_v35, %v3364_v26  ;;  %v2916_v10 = vrot.slane %v2914_v32, 5  ;;  %4323 = vmatprep.subr.msk.bf16.mxu1 %vm2375_vm4, %v5420_v15  ;;  %v5455_v2 = vld [vmem:[#allocation2 + $0x3c] sm:$0x1] }
 0x211   : > { %v3382_v54 = vrot.slane %v3380_v5, 4  ;;  %v3383_v40 = vshll.u32 %v3327_v6, 16  ;;  %v3389_v51 = vshll.u32 %v5423_v50, 16  ;;  %v2919_v20 = vshrl.u32 %v2830_v1, 16  ;;  %v5460_v5 = vld [vmem:[#allocation2 + $0x44] sm:$0x1] }
 0x212   : > { %v2912_v3 = vrot.slane %v2911_v45, 4  ;;  %v3372_v14 = vor.u32 %v3371_v36, %v3368_v59  ;;  %4288 = vmatprep.mubr.msk.bf16.mxu0 %vm2362_vm3, %v3991_v53  ;;  %v2922_v49 = vshll.u32 %v2830_v1, 16  ;;  %v2933_v16 = vshrl.u32 %v2832_v22, 16 }
 0x213   : > { %v3385_v0 = vrot.slane %v3383_v40, 5  ;;  %v5440_v30 = vrot.slane %v3442_v29, 4  ;;  %v2903_v63 = vsel %vm4567_vm12, %v2898_v27, %v2902_v28  ;;  %v2921_v31 = vrot.slane %v2919_v20, 4 }
 0x214   : > { %v2917_v9 = vsel %vm4567_vm12, %v2912_v3, %v2916_v10  ;;  %v3373_v43 = vrot.slane %v3372_v14, 4  ;;  %v3377_v23 = vrot.slane %v3375_v24, 5  ;;  %v2924_v18 = vrot.slane %v2922_v49, 5  ;;  %v4373_v49 = vld [vmem:[#allocation2 + $0x10] ss:$8 sps:$4 sm:$0xff]  }
 0x215   : > { %v3961_v39 = vcombine.low %v2903_v63, %v2917_v9  ;;  %v3386_v19 = vor.u32 %v3385_v0, %v3382_v54  ;;  %v3391_v37 = vrot.slane %v3389_v51, 5  ;;  %v2928_v57 = vshll.u32 %v5361_v58, 16 }
 0x216   : > { %v2935_v56 = vrot.slane %v2933_v16, 4  ;;  %v2936_v8 = vshll.u32 %v2832_v22, 16  ;;  %v2925_v46 = vor.u32 %v2924_v18, %v2921_v31  ;;  %v3394_v12 = vshrl.u32 %v3329_v38, 16 }
 0x217   : > { %4262 = vmatprep.mubr.msk.bf16.mxu1 %vm2362_vm3, %v3961_v39  ;;  %v3387_v29 = vrot.slane %v3386_v19, 4  ;;  %v3397_v33 = vshll.u32 %v3329_v38, 16  ;;  %v3378_v11 = vsel %vm4567_vm12, %v3373_v43, %v3377_v23  ;;  %v2942_v61 = vshll.u32 %v5366_v21, 16 }
 0x218   : > { %v2938_v17 = vrot.slane %v2936_v8, 5  ;;  %v3408_v6 = vshrl.u32 %v3331_v47, 16  ;;  %v2926_v44 = vrot.slane %v2925_v46, 4  ;;  %v3396_v52 = vrot.slane %v3394_v12, 4  ;;  %v4375_v8 = vld [vmem:[#allocation2 + $0x30] ss:$8 sps:$4 sm:$0xff]  }
 0x219   : > { %v3392_v58 = vsel %vm4567_vm12, %v3387_v29, %v3391_v37  ;;  %v3399_v32 = vrot.slane %v3397_v33, 5  ;;  %v2930_v35 = vrot.slane %v2928_v57, 5  ;;  %v3447_v55 = vrot.slane %v3445_v4, 5  ;;  %v3550_v37 = vld [vmem:[#allocation2 + $0x10] sm:$0xe] }
 0x21a   : > { %v3992_v1 = vcombine.low %v3378_v11, %v3392_v58  ;;  %v2939_v60 = vor.u32 %v2938_v17, %v2935_v56  ;;  %v3403_v21 = vshll.u32 %v5451_v41, 16  ;;  %v3410_v59 = vrot.slane %v3408_v6, 4  ;;  %v4374_v57 = vld [vmem:[#allocation2 + $0x20] ss:$8 sps:$4 sm:$0xff]   ;;  %v3551_v29 = vld [vmem:[#allocation2 + $0x18] sm:$0xe] }
 0x21b   : > { %v3400_v28 = vor.u32 %v3399_v32, %v3396_v52  ;;  %v3411_v24 = vshll.u32 %v3331_v47, 16  ;;  %v2944_v26 = vrot.slane %v2942_v61, 5  ;;  %v3422_v27 = vshrl.u32 %v3333_v7, 16  ;;  %v3553_v11 = vld [vmem:[#allocation2 + $0x28] sm:$0xe] }
 0x21c   : > { %4289 = vmatmul.mubr.msk.bf16.vlgmr.msra.gmra.mxu0 %vm2362_vm3, %v3992_v1  ;;  %v2940_v22 = vrot.slane %v2939_v60, 4  ;;  %v3425_v45 = vshll.u32 %v3333_v7, 16  ;;  %v2931_v36 = vsel %vm4567_vm12, %v2926_v44, %v2930_v35  ;;  %v3417_v4 = vshll.u32 %v5455_v2, 16  ;;  %v3554_v17 = vld [vmem:[#allocation2 + $0x30] sm:$0xe] }
 0x21d   : > { %v3401_v53 = vrot.slane %v3400_v28, 4  ;;  %v3413_v10 = vrot.slane %v3411_v24, 5  ;;  %v3424_v40 = vrot.slane %v3422_v27, 4  ;;  %v3431_v14 = vshll.u32 %v5460_v5, 16  ;;  %v4376_v61 = vld [vmem:[#allocation2 + $0x40] ss:$8 sps:$4 sm:$0xff]  }
 0x21e   : > { %v2945_v54 = vsel %vm4567_vm12, %v2940_v22, %v2944_v26  ;;  %v3427_v3 = vrot.slane %v3425_v45, 5  ;;  %v3405_v20 = vrot.slane %v3403_v21, 5  ;;  %v3419_v43 = vrot.slane %v3417_v4, 5  ;;  %v3552_v6 = vld [vmem:[#allocation2 + $0x20] sm:$0xe] }
 0x21f   : > { %v3962_v51 = vcombine.low %v2931_v36, %v2945_v54  ;;  %v3414_v0 = vor.u32 %v3413_v10, %v3410_v59  ;;  %v3433_v38 = vrot.slane %v3431_v14, 5  ;;  %v3448_v39 = vsel %vm4567_vm12, %v5440_v30, %v3447_v55  ;;  %v3555_v52 = vld [vmem:[#allocation2 + $0x38] sm:$0xe]  ;;  %v3557_v28 = vld [vmem:[#allocation2 + $0x48] sm:$0xe] }
 0x220   : > { %v3428_v16 = vor.u32 %v3427_v3, %v3424_v40  ;;  %v3406_v63 = vsel %vm4567_vm12, %v3401_v53, %v3405_v20  ;;  %v3632_v56 = vsel %vm2375_vm4, %v5420_v15, 0  ;;  %v3999_v30 = vrot.slane %v3550_v37, 9  ;;  %v3556_v21 = vld [vmem:[#allocation2 + $0x40] sm:$0xe] }
 0x221   : > { %4263 = vmatmul.mubr.msk.bf16.gmra.mxu1 %vm2362_vm3, %v3962_v51  ;;  %v3415_v9 = vrot.slane %v3414_v0, 4  ;;  %v3576_v46 = vrot.slane %v5384_v42, 5  ;;  %v4000_v34 = vrot.slane %v3551_v29, 9  ;;  %v3580_v12 = vrot.slane %v5394_v25, 5 }
 0x222   : > { %4278 = vmatprep.mubr.msk.bf16.mxu1 %vm2362_vm3, %v4373_v49  ;;  %v3429_v31 = vrot.slane %v3428_v16, 4  ;;  %v4002_v44 = vrot.slane %v3553_v11, 9  ;;  %v3588_v42 = vrot.slane %v5423_v50, 5  ;;  %v4003_v32 = vrot.slane %v3554_v17, 9 }
 0x223   : > { %v3420_v23 = vsel %vm4567_vm12, %v3415_v9, %v3419_v43  ;;  %v3577_v33 = vsel %vm4563_vm11, %v3999_v30, %v3576_v46  ;;  %v3581_v15 = vsel %vm4563_vm11, %v4000_v34, %v3580_v12  ;;  %v3592_v25 = vrot.slane %v5451_v41, 5 }
 0x224   : > { %v3993_v19 = vcombine.low %v3406_v63, %v3420_v23  ;;  %v3434_v18 = vsel %vm4567_vm12, %v3429_v31, %v3433_v38  ;;  %v4007_v58 = vcombine.low %v3577_v33, %v3581_v15  ;;  %v4001_v7 = vrot.slane %v3552_v6, 9 }
 0x225   : > { %v3994_v47 = vcombine.low %v3434_v18, %v3448_v39  ;;  %v3584_v1 = vrot.slane %v5412_v62, 5  ;;  %v4004_v35 = vrot.slane %v3555_v52, 9  ;;  %v3596_v60 = vrot.slane %v5455_v2, 5 }
 0x226   : > { %4292 = vmatprep.mubr.msk.bf16.mxu0 %vm2362_vm3, %v3993_v19  ;;  %v3589_v55 = vsel %vm4563_vm11, %v4002_v44, %v3588_v42  ;;  %v3593_v50 = vsel %vm4563_vm11, %v4003_v32, %v3592_v25  ;;  %v4006_v22 = vrot.slane %v3557_v28, 9  ;;  %v4005_v26 = vrot.slane %v3556_v21, 9 }
 0x227   : > { %4293 = vmatmul.mubr.msk.bf16.gmra.mxu0 %vm2362_vm3, %v3994_v47  ;;  %v3585_v59 = vsel %vm4563_vm11, %v4001_v7, %v3584_v1  ;;  %v3597_v24 = vsel %vm4563_vm11, %v4004_v35, %v3596_v60  ;;  %v3600_v2 = vrot.slane %v5460_v5, 5  ;;  %v3604_v27 = vrot.slane %v5184_v48, 5 }
 0x228   : > { %v4008_v41 = vcombine.low %v3585_v59, %v3589_v55  ;;  %v4009_v62 = vcombine.low %v3593_v50, %v3597_v24 }
 0x229   : > { %4279 = vmatmul.mubr.msk.bf16.vlgmr.msra.gmra.mxu1 %vm2362_vm3, %v4374_v57  ;;  %v3601_v45 = vsel %vm4563_vm11, %v4005_v26, %v3600_v2  ;;  %v3605_v36 = vsel %vm4563_vm11, %v4006_v22, %v3604_v27 }
 0x22a   : > { %4297 = vmatpush3.bf16.msra.mxu1 %v3632_v56  ;;  %4282 = vmatprep.mubr.msk.bf16.mxu1 %vm2362_vm3, %v4375_v8  ;;  %v4010_v53 = vcombine.low %v3601_v45, %v3605_v36 }
 0x231   : > { %4283 = vmatmul.mubr.msk.bf16.gmra.mxu1 %vm2362_vm3, %v4376_v61 }
 0x232   : > { %4298 = vmatprep.mubr.msk.bf16.mxu1 %vm2362_vm3, %v4007_v58 }
 0x239   : > { %4299 = vmatmul.mubr.msk.bf16.vlgmr.msra.gmra.mxu1 %vm2362_vm3, %v4008_v41 }
 0x23a   : > { %4302 = vmatprep.mubr.msk.bf16.mxu1 %vm2362_vm3, %v4009_v62 }
 0x241   : > { %4303 = vmatmul.mubr.msk.bf16.gmra.mxu1 %vm2362_vm3, %v4010_v53 }
 0x2a1   : > { %v4230_v10 = vpop.f32.mrf.mxu0 }
 0x2a3   : > { %v2513_v4 = vpop.f32.mrf.mxu0 }
 0x2a5   : > { %v4231_v54 = vpop.f32.mrf.mxu0 }
 0x2a7   : > { %v2516_v40 = vpop.f32.mrf.mxu0 }
 0x2ae   : > { %v4234_v5 = vpop.f32.mrf.mxu0  ;;  %v4220_v3 = vpop.f32.mrf.mxu1 }
 0x2af   : > { %v2522_v35 = vadd.f32 %v4230_v10, %v4220_v3 }
 0x2b0   : > { %v2529_v48 = vpop.f32.mrf.mxu0  ;;  %v2413_v14 = vpop.f32.mrf.mxu1 }
 0x2b1   : > { %v2514_v55 = vadd.f32 %v2513_v4, %v2413_v14 }
 0x2b2   : > { %v4235_v51 = vpop.f32.mrf.mxu0  ;;  %v4221_v20 = vpop.f32.mrf.mxu1 }
 0x2b3   : > { %v2525_v59 = vadd.f32 %v4231_v54, %v4221_v20 }
 0x2b4   : > { %v5515_v0 = vpop.f32.mrf.mxu0  ;;  %v2416_v49 = vpop.f32.mrf.mxu1 }
 0x2b5   : > { %v2517_v22 = vadd.f32 %v2516_v40, %v2416_v49 }
 0x2b6   : > { %v4250_v16 = vpop.f32.mrf.mxu0  ;;  %v4224_v63 = vpop.f32.mrf.mxu1 }
 0x2b7   : > { %v2538_v2 = vadd.f32 %v4234_v5, %v4224_v63 }
 0x2b8   : > { %v2779_v13 = vpop.f32.mrf.mxu0  ;;  %v2429_v9 = vpop.f32.mrf.mxu1 }
 0x2ba   : > { %v4251_v43 = vpop.f32.mrf.mxu0  ;;  %v4225_v31 = vpop.f32.mrf.mxu1 }
 0x2bb   : > { %v2541_v14 = vadd.f32 %v4235_v51, %v4225_v31 }
 0x2bc   : > { %v2782_v38 = vpop.f32.mrf.mxu0  ;;  %v2432_v39 = vpop.f32.mrf.mxu1 }
 0x2bd   : > { %v2533_v49 = vadd.f32 %v5515_v0, %v2432_v39 }
 0x2be   : > { %v4254_v23 = vpop.f32.mrf.mxu0  ;;  %v4240_v19 = vpop.f32.mrf.mxu1 }
 0x2bf   : > { %v2695_v28 = vadd.f32 %v4240_v19, %v2522_v35 }
 0x2c0   : > { %v5517_v18 = vpop.f32.mrf.mxu0  ;;  %v2662_v47 = vpop.f32.mrf.mxu1 }
 0x2c1   : > { %v2693_v41 = vadd.f32 %v2662_v47, %v2514_v55  ;;  %v2812_v26 = vadd.f32 %v4250_v16, %v2695_v28 }
 0x2c2   : > { %v5519_v37 = vpop.f32.mrf.mxu0  ;;  %v4241_v57 = vpop.f32.mrf.mxu1 }
 0x2c3   : > { %v2696_v62 = vadd.f32 %v4241_v57, %v2525_v59 }
 0x2c4   : > { %v5521_v56 = vpop.f32.mrf.mxu0  ;;  %v2665_v8 = vpop.f32.mrf.mxu1 }
 0x2c5   : > { %v2694_v36 = vadd.f32 %v2665_v8, %v2517_v22  ;;  %v2813_v4 = vadd.f32 %v4251_v43, %v2696_v62 }
 0x2c6   : > { %v4244_v29 = vpop.f32.mrf.mxu1  ;;  %v4270_v30 = vpop.f32.mrf.mxu0 }
 0x2c7   : > { %v2811_v47 = vadd.f32 %v2782_v38, %v2694_v36 }
 0x2c8   : > { %v2678_v46 = vpop.f32.mrf.mxu1  ;;  %v3165_v12 = vpop.f32.mrf.mxu0 }
 0x2ca   : > { %v4245_v34 = vpop.f32.mrf.mxu1  ;;  %v4271_v11 = vpop.f32.mrf.mxu0 }
 0x2cb   : > { %v2700_v5 = vadd.f32 %v4245_v34, %v2541_v14 }
 0x2cc   : > { %v2681_v33 = vpop.f32.mrf.mxu1  ;;  %v3168_v61 = vpop.f32.mrf.mxu0 }
 0x2cd   : > { %v2817_v38 = vadd.f32 %v5519_v37, %v2700_v5 }
 0x2ce   : > { %v4260_v17 = vpop.f32.mrf.mxu1  ;;  %v4274_v6 = vpop.f32.mrf.mxu0 }
 0x2cf   : > { %v3041_v53 = vadd.f32 %v4260_v17, %v2812_v26 }
 0x2d0   : > { %v3008_v15 = vpop.f32.mrf.mxu1  ;;  %v5523_v44 = vpop.f32.mrf.mxu0 }
 0x2d1   : > { %5611 = vst [vmem:[#allocation12_spill] sm:$0xff] %v5523_v44  ;;  %v2699_v44 = vadd.f32 %v4244_v29, %v2538_v2  ;;  %v3198_v40 = vadd.f32 %v4270_v30, %v3041_v53 }
 0x2d2   : > { %v4261_v58 = vpop.f32.mrf.mxu1  ;;  %v5525_v52 = vpop.f32.mrf.mxu0 }
 0x2d3   : > { %5612 = vst [vmem:[#allocation6_spill] sm:$0xff] %v5525_v52  ;;  %v2810_v52 = vadd.f32 %v2779_v13, %v2693_v41  ;;  %v3042_v20 = vadd.f32 %v4261_v58, %v2813_v4  ;;  %v2816_v16 = vadd.f32 %v4254_v23, %v2699_v44 }
 0x2d4   : > { %v3011_v42 = vpop.f32.mrf.mxu1  ;;  %v5527_v7 = vpop.f32.mrf.mxu0 }
 0x2d5   : > { %5613 = vst [vmem:[#allocation7_spill] sm:$0xff] %v5527_v7  ;;  %v2530_v7 = vadd.f32 %v2529_v48, %v2429_v9  ;;  %v3039_v3 = vadd.f32 %v3008_v15, %v2810_v52  ;;  %v3040_v57 = vadd.f32 %v3011_v42, %v2811_v47  ;;  %v2698_v48 = vadd.f32 %v2681_v33, %v2533_v49 }
 0x2d7   : > { %v2697_v19 = vadd.f32 %v2678_v46, %v2530_v7  ;;  %v3196_v13 = vadd.f32 %v3165_v12, %v3039_v3  ;;  %v3199_v46 = vadd.f32 %v4271_v11, %v3042_v20  ;;  %v3197_v39 = vadd.f32 %v3168_v61, %v3040_v57 }
 0x2d8   : > { %v2815_v15 = vadd.f32 %v5521_v56, %v2698_v48 }
 0x2d9   : > { %v2814_v29 = vadd.f32 %v5517_v18, %v2697_v19  ;;  %v4015_v18 = vld [vmem:[%s5568_s4] ss:$0 sm:$0xff] }
 0x2dc   : > { %v4290_v50 = vpop.f32.mrf.mxu0  ;;  %v5616_v22 = vld [vmem:[#allocation7_spill] sm:$0xff] }
 0x2de   : > { %v3511_v27 = vpop.f32.mrf.mxu0 }
 0x2e0   : > { %v4291_v35 = vpop.f32.mrf.mxu0 }
 0x2e1   : > { %v4264_v32 = vpop.f32.mrf.mxu1 }
 0x2e2   : > { %v3045_v9 = vadd.f32 %v4264_v32, %v2816_v16  ;;  %v3514_v43 = vpop.f32.mrf.mxu0  ;;  %v5614_v32 = vld [vmem:[#allocation12_spill] sm:$0xff] }
 0x2e3   : > { %v3024_v25 = vpop.f32.mrf.mxu1 }
 0x2e4   : > { %v3043_v17 = vadd.f32 %v3024_v25, %v2814_v29  ;;  %v3202_v33 = vadd.f32 %v4274_v6, %v3045_v9  ;;  %v5615_v6 = vld [vmem:[#allocation6_spill] sm:$0xff] }
 0x2e5   : > { %v4265_v1 = vpop.f32.mrf.mxu1 }
 0x2e6   : > { %v3046_v34 = vadd.f32 %v4265_v1, %v2817_v38  ;;  %v3200_v25 = vadd.f32 %v5614_v32, %v3043_v17 }
 0x2e7   : > { %v3027_v60 = vpop.f32.mrf.mxu1  ;;  %v4294_v12 = vpop.f32.mrf.mxu0 }
 0x2e8   : > { %v3044_v52 = vadd.f32 %v3027_v60, %v2815_v15 }
 0x2e9   : > { %v4280_v21 = vpop.f32.mrf.mxu1  ;;  %v3527_v56 = vpop.f32.mrf.mxu0 }
 0x2ea   : > { %v3315_v8 = vadd.f32 %v4280_v21, %v3198_v40  ;;  %v3201_v62 = vadd.f32 %v5616_v22, %v3044_v52 }
 0x2eb   : > { %v3282_v24 = vpop.f32.mrf.mxu1 }
 0x2ec   : > { %v3313_v31 = vadd.f32 %v3282_v24, %v3196_v13  ;;  %v3544_v23 = vadd.f32 %v4290_v50, %v3315_v8  ;;  %v3203_v50 = vadd.f32 %v5615_v6, %v3046_v34 }
 0x2ed   : > { %v4281_v45 = vpop.f32.mrf.mxu1 }
 0x2ee   : > { %v3316_v0 = vadd.f32 %v4281_v45, %v3199_v46  ;;  %v3542_v42 = vadd.f32 %v3511_v27, %v3313_v31 }
 0x2ef   : > { %v3285_v10 = vpop.f32.mrf.mxu1 }
 0x2f0   : > { %v3314_v44 = vadd.f32 %v3285_v10, %v3197_v39  ;;  %v3545_v55 = vadd.f32 %v4291_v35, %v3316_v0  ;;  %v4295_v10 = vpop.f32.mrf.mxu0 }
 0x2f1   : > { %v4284_v54 = vpop.f32.mrf.mxu1 }
 0x2f2   : > { %v3319_v37 = vadd.f32 %v4284_v54, %v3202_v33  ;;  %v3543_v24 = vadd.f32 %v3514_v43, %v3314_v44  ;;  %v3530_v16 = vpop.f32.mrf.mxu0 }
 0x2f3   : > { %v3298_v63 = vpop.f32.mrf.mxu1 }
 0x2f4   : > { %v3317_v28 = vadd.f32 %v3298_v63, %v3200_v25  ;;  %v3548_v2 = vadd.f32 %v4294_v12, %v3319_v37 }
 0x2f5   : > { %v4285_v51 = vpop.f32.mrf.mxu1 }
 0x2f6   : > { %v3320_v27 = vadd.f32 %v4285_v51, %v3203_v50  ;;  %v3546_v4 = vadd.f32 %v3527_v56, %v3317_v28 }
 0x2f7   : > { %v3301_v30 = vpop.f32.mrf.mxu1 }
 0x2f8   : > { %v3318_v14 = vadd.f32 %v3301_v30, %v3201_v62  ;;  %v3549_v5 = vadd.f32 %v4295_v10, %v3320_v27 }
 0x2f9   : > { %v4300_v58 = vpop.f32.mrf.mxu1 }
 0x2fa   : > { %v3701_v11 = vadd.f32 %v4300_v58, %v3544_v23  ;;  %v3547_v48 = vadd.f32 %v3530_v16, %v3318_v14 }
 0x2fb   : > { %v3668_v61 = vpop.f32.mrf.mxu1 }
 0x2fc   : > { %v3716_v7 = vadd.f32 %v4015_v18, %v3701_v11  ;;  %v3699_v1 = vadd.f32 %v3668_v61, %v3542_v42 }
 0x2fd   : > { %v4301_v21 = vpop.f32.mrf.mxu1 }
 0x2fe   : > { %v3724_v59 = vmax.f32 %v3716_v7, 0.0  ;;  %v3714_v60 = vadd.f32 %v4015_v18, %v3699_v1  ;;  %v3702_v41 = vadd.f32 %v4301_v21, %v3545_v55 }
 0x2ff   : > { %v3671_v26 = vpop.f32.mrf.mxu1 }
 0x300   : > { %3732 = vst.msk [vmem:[%s5542_s22 + $0x10] sm:$0xff] %vm2362_vm3, %v3724_v59  ;;  %v3722_v45 = vmax.f32 %v3714_v60, 0.0  ;;  %v3717_v36 = vadd.f32 %v4015_v18, %v3702_v41  ;;  %v3700_v53 = vadd.f32 %v3671_v26, %v3543_v24 }
 0x301   : > { %v4304_v3 = vpop.f32.mrf.mxu1 }
 0x302   : > { %3730 = vst.msk [vmem:[%s5542_s22] sm:$0xff] %vm2362_vm3, %v3722_v45  ;;  %v3725_v19 = vmax.f32 %v3717_v36, 0.0  ;;  %v3715_v35 = vadd.f32 %v4015_v18, %v3700_v53  ;;  %v3705_v54 = vadd.f32 %v4304_v3, %v3548_v2 }
 0x303   : > { %v3684_v20 = vpop.f32.mrf.mxu1 }
 0x304   : > { %3733 = vst.msk [vmem:[%s5542_s22 + $0x18] sm:$0xff] %vm2362_vm3, %v3725_v19  ;;  %v3723_v47 = vmax.f32 %v3715_v35, 0.0  ;;  %v3720_v40 = vadd.f32 %v4015_v18, %v3705_v54  ;;  %v3703_v49 = vadd.f32 %v3684_v20, %v3546_v4 }
 0x305   : > { %v4305_v63 = vpop.f32.mrf.mxu1 }
 0x306   : > { %3731 = vst.msk [vmem:[%s5542_s22 + $0x8] sm:$0xff] %vm2362_vm3, %v3723_v47  ;;  %v3728_v57 = vmax.f32 %v3720_v40, 0.0  ;;  %v3718_v8 = vadd.f32 %v4015_v18, %v3703_v49  ;;  %v3706_v13 = vadd.f32 %v4305_v63, %v3549_v5 }
 0x307   : > { %v3687_v9 = vpop.f32.mrf.mxu1 }
 0x308   : > { %3736 = vst.msk [vmem:[%s5542_s22 + $0x30] sm:$0xff] %vm2362_vm3, %v3728_v57  ;;  %v3726_v29 = vmax.f32 %v3718_v8, 0.0  ;;  %v3721_v43 = vadd.f32 %v4015_v18, %v3706_v13  ;;  %v3704_v51 = vadd.f32 %v3687_v9, %v3547_v48 }
 0x30a   : > { %3734 = vst.msk [vmem:[%s5542_s22 + $0x20] sm:$0xff] %vm2362_vm3, %v3726_v29  ;;  %v3729_v31 = vmax.f32 %v3721_v43, 0.0  ;;  %v3719_v46 = vadd.f32 %v4015_v18, %v3704_v51 }
 0x30c   : > { %3737 = vst.msk [vmem:[%s5542_s22 + $0x38] sm:$0xff] %vm2362_vm3, %v3729_v31  ;;  %v3727_v17 = vmax.f32 %v3719_v46, 0.0 }
 0x30e   : > { %3735 = vst.msk [vmem:[%s5542_s22 + $0x28] sm:$0xff] %vm2362_vm3, %v3727_v17 }
 0x30f PF: > { %s15_s18 = sadd.s32 1, %s4383_s18  }
 0x310   : > { %p12_p4 = scmp.ge.s32.totalorder %s15_s18, 4  }
 0x312   :  { %14 = sbr.rel (!%p12_p4) target bundleno = 1 (0x1), region = 73 }

</bundles_post_ra>
